<compile_context>
chip_gen: v7x
topology: tpu7x:2x2x1
jax: 0.10.0
libtpu: 0.0.40
codegen_flags: <defaults>
</compile_context>

<pallas_src>
import functools

import jax
import jax.numpy as jnp
from jax import lax
from jax.experimental import pallas as pl
from jax.experimental.pallas import tpu as pltpu


def _conv3x3_9c(src, w_ref, rows, W, C):
    """3x3 'SAME' conv as a single K=9C MXU matmul.

    src   : (rows+2, W+2, C) bf16 value (1-pixel halo already included)
    w_ref : (9C, C) bf16 ref, contraction axis ordered (ky, kx, cin)
    returns (rows*W, C) f32
    """
    parts = []
    for ky in range(3):
        for kx in range(3):
            parts.append(src[ky:ky + rows, kx:kx + W, :].reshape(rows * W, C))
    lhs = jnp.concatenate(parts, axis=-1)                      # (rows*W, 9C)
    return jnp.dot(lhs, w_ref[...], preferred_element_type=jnp.float32)


def rcab_conv_kernel(xpad_ref, w1_ref, b1_ref, w2_ref, b2_ref,
                     res_ref, psum_ref, *, TH, H, W, C):
    """conv1 -> ReLU -> conv2 for one (batch, row-block) grid step.

    xpad_ref : (H+4, W+2, C) bf16  whole padded image (resident across h)
    res_ref  : (TH*W, C)     f32   pre-scale conv2 output for this row block
    psum_ref : (1, 8, C)     f32   pooled partial sum (8 sublane groups)
    """
    h = pl.program_id(1)
    r0 = pl.multiple_of(h * TH, TH)                 # first output row of block

    # Halo'd input slab, loaded once; every conv window below is a slice of
    # this value (no re-reads of ~90%-overlapping ref windows).
    slab = xpad_ref[pl.ds(r0, TH + 4), :, :]        # (TH+4, W+2, C) bf16

    # conv1 + bias + ReLU on TH+2 rows (feature-map rows r0-1 .. r0+TH, i.e. a
    # 1-row recomputed halo for conv2).  Bias read once (no inner loop left).
    h1 = jnp.maximum(_conv3x3_9c(slab, w1_ref, TH + 2, W, C) + b1_ref[...],
                     0.0)                                       # ((TH+2)*W, C)
    h1 = h1.reshape(TH + 2, W, C)

    # Halo rows that fall outside the image are conv2's ZERO padding rows (not
    # conv1 evaluated outside the image) -> mask them to zero (branch-free).
    row_id = r0 - 1 + lax.broadcasted_iota(jnp.int32, (TH + 2, 1, 1), 0)
    valid = jnp.logical_and(row_id >= 0, row_id <= H - 1)
    h1 = jnp.where(valid, h1, 0.0).astype(jnp.bfloat16)

    # Zero column halo for conv2.
    zc = jnp.zeros((TH + 2, 1, C), jnp.bfloat16)
    hslab = jnp.concatenate([zc, h1, zc], axis=1)               # (TH+2, W+2, C)

    # conv2 + bias -> pre-scale residual, stored channel-minor (natural MXU
    # output layout; no lane-fold relayout in this hot kernel).
    res = _conv3x3_9c(hslab, w2_ref, TH, W, C) + b2_ref[...]    # (TH*W, C) f32
    res_ref[...] = res

    # Pooled partial sum for the CA global average pool, pre-reduced to an
    # (8, C) tile (the remaining reduction happens in the wrapper).
    psum_ref[...] = jnp.sum(res.reshape(TH * W // 8, 8, C), axis=0,
                            keepdims=True)


def rcab_finalize_kernel(res_ref, x_ref, scale_ref, o_ref):
    """out = res * channel_scale + x on lane-dense (rows, W*C) f32 blocks."""
    o_ref[...] = res_ref[...] * scale_ref[...] + x_ref[...]


def _vmem_limit_bytes(TH, H, W, C):
    """Per-step VMEM live-set estimate for the conv pass (review: derive the
    limit from the actual block sizes instead of hard-coding 32 MiB)."""
    bf, f4 = 2, 4
    xpad = 2 * (H + 4) * (W + 2) * C * bf          # resident input, 2 buffers
    wgt = 2 * 2 * 9 * C * C * bf                   # both conv weights, 2 bufs
    out = 2 * TH * W * C * f4                      # res output block, 2 bufs
    lhs = ((TH + 2) * W + TH * W) * 9 * C * bf     # im2col LHS values
    tmp = 4 * (TH + 2) * (W + 2) * C * f4          # h1 / hslab / temporaries
    est = xpad + wgt + out + 3 * lhs + tmp + (4 << 20)
    # Cap at 64 MiB so the same limit is valid on v7x; v5e/v6e (128 MiB) can
    # simply use larger row blocks under the same cap.
    return int(min(max(est, 16 << 20), 64 << 20))


def rcab_pallas(x_nchw, params, *, row_block=16):
    """RCAB forward. x_nchw: (N, C, H, W) float32, PyTorch layout."""
    w1, b1, w2, b2, wd1, bd1, wd2, bd2 = params
    N, C, H, W = x_nchw.shape
    TH = min(row_block, H)
    assert H % TH == 0, "H must be divisible by the row block"
    assert (TH * W) % 8 == 0, "row_block * W must be a multiple of 8"
    nH = H // TH

    # NCHW -> NHWC; pad rows by 2 / cols by 1 once on the XLA side (so every
    # halo'd row-block read is in-bounds); conv operands are bf16 (f32 acc).
    x_nhwc = jnp.transpose(x_nchw, (0, 2, 3, 1))
    xpad = jnp.pad(x_nhwc, ((0, 0), (2, 2), (1, 1), (0, 0))).astype(jnp.bfloat16)

    # (3,3,C,C) HWIO -> (9C, C): contraction axis ordered (ky, kx, cin),
    # matching the in-kernel window concatenation (single K=9C matmul/conv).
    w1k = w1.reshape(9 * C, C).astype(jnp.bfloat16)
    w2k = w2.reshape(9 * C, C).astype(jnp.bfloat16)

    conv_kernel = functools.partial(rcab_conv_kernel, TH=TH, H=H, W=W, C=C)
    const2 = lambda n, h: (0, 0)

    # ---- pass A: conv1 + ReLU + conv2, tiled over (batch, row blocks) ------
    res, psum = pl.pallas_call(
        conv_kernel,
        out_shape=(jax.ShapeDtypeStruct((N, H * W, C), jnp.float32),
                   jax.ShapeDtypeStruct((N, nH, 8, C), jnp.float32)),
        grid_spec=pltpu.PrefetchScalarGridSpec(
            num_scalar_prefetch=0,
            grid=(N, nH),
            in_specs=[
                # Whole padded bf16 image per batch element; constant index
                # map along h -> resident in VMEM across the row-block axis
                # (re-DMA'd only when n changes).
                # TODO(synk): for very large images, switch this to a manual
                # halo DMA (memory_space=pl.ANY + make_async_copy) so the
                # input block scales with TH instead of H.
                pl.BlockSpec((None, H + 4, W + 2, C), lambda n, h: (n, 0, 0, 0)),
                pl.BlockSpec((9 * C, C), const2),   # conv1 weight (bf16)
                pl.BlockSpec((1, C), const2),       # conv1 bias   (f32)
                pl.BlockSpec((9 * C, C), const2),   # conv2 weight (bf16)
                pl.BlockSpec((1, C), const2),       # conv2 bias   (f32)
            ],
            out_specs=[
                pl.BlockSpec((None, TH * W, C), lambda n, h: (n, h, 0)),
                pl.BlockSpec((None, 1, 8, C), lambda n, h: (n, h, 0, 0)),
            ],
        ),
        compiler_params=pltpu.CompilerParams(
            dimension_semantics=("parallel", "parallel"),
            vmem_limit_bytes=_vmem_limit_bytes(TH, H, W, C),
        ),
    )(xpad, w1k, b1, w2k, b2)

    # ---- channel attention squeeze / excite (tiny, plain JAX) --------------
    pooled = jnp.sum(psum, axis=(1, 2)) * (1.0 / (H * W))          # (N, C)
    hid = jax.nn.relu(pooled @ wd1 + bd1)                          # (N, Cr)
    scale = jax.nn.sigmoid(hid @ wd2 + bd2)                        # (N, C)
    scale_wc = jnp.tile(scale, (1, W)).reshape(N, 1, W * C)        # pre-tiled

    # ---- pass B: out = res * scale + x (f32 identity path), lane-dense -----
    # res (N, H*W, C) and x (NHWC) reinterpret as lane-dense (N, H, W*C) for
    # free (contiguous reshape); unmasked stores when W*C % 128 == 0.
    res_lane = res.reshape(N, H, W * C)
    x_lane = x_nhwc.reshape(N, H, W * C)
    THb = H
    for cand in (128, 64, 32, 16, 8):
        if H > cand and H % cand == 0:
            THb = cand
            break

    out_lane = pl.pallas_call(
        rcab_finalize_kernel,
        out_shape=jax.ShapeDtypeStruct((N, H, W * C), jnp.float32),
        grid_spec=pltpu.PrefetchScalarGridSpec(
            num_scalar_prefetch=0,
            grid=(N, H // THb),
            in_specs=[
                pl.BlockSpec((None, THb, W * C), lambda n, h: (n, h, 0)),
                pl.BlockSpec((None, THb, W * C), lambda n, h: (n, h, 0)),
                pl.BlockSpec((None, 1, W * C), lambda n, h: (n, 0, 0)),
            ],
            out_specs=pl.BlockSpec((None, THb, W * C), lambda n, h: (n, h, 0)),
        ),
        compiler_params=pltpu.CompilerParams(
            dimension_semantics=("parallel", "parallel")),
    )(res_lane, x_lane, scale_wc)

    # TODO(synk): when stacking RCABs, keep activations in this NHWC /
    # lane-dense form between blocks instead of converting back to NCHW.
    return jnp.transpose(out_lane.reshape(N, H, W, C), (0, 3, 1, 2))


def rcab_reference(x_nchw, params, conv_dtype=jnp.float32):
    """Pure-JAX reference. conv_dtype=bfloat16 mirrors the kernel's MXU input
    precision (f32 accumulation, f32 identity/residual path);
    conv_dtype=float32 is exact PyTorch-f32 semantics."""
    w1, b1, w2, b2, wd1, bd1, wd2, bd2 = params
    f32 = jnp.float32
    cast = lambda a: a.astype(conv_dtype).astype(f32)
    x = jnp.transpose(x_nchw, (0, 2, 3, 1)).astype(f32)

    def conv(v, w, b):
        y = lax.conv_general_dilated(
            cast(v), cast(w), window_strides=(1, 1), padding="SAME",
            dimension_numbers=("NHWC", "HWIO", "NHWC"))
        return y + b.reshape(1, 1, 1, -1)

    h = jax.nn.relu(conv(x, w1, b1))
    res = conv(h, w2, b2)
    pooled = jnp.mean(res, axis=(1, 2), keepdims=True)                # (N,1,1,C)
    hid = jax.nn.relu(jnp.einsum("nijc,cr->nijr", pooled, wd1)
                      + bd1.reshape(1, 1, 1, -1))
    scale = jax.nn.sigmoid(jnp.einsum("nijr,rc->nijc", hid, wd2)
                           + bd2.reshape(1, 1, 1, -1))
    out = res * scale + x
    return jnp.transpose(out, (0, 3, 1, 2))


def make_params(key, n_feat, reduction):
    cr = n_feat // reduction
    ks = jax.random.split(key, 8)
    sc = 0.1
    w1 = sc * jax.random.normal(ks[0], (3, 3, n_feat, n_feat), jnp.float32)
    b1 = sc * jax.random.normal(ks[1], (1, n_feat), jnp.float32)
    w2 = sc * jax.random.normal(ks[2], (3, 3, n_feat, n_feat), jnp.float32)
    b2 = sc * jax.random.normal(ks[3], (1, n_feat), jnp.float32)
    wd1 = sc * jax.random.normal(ks[4], (n_feat, cr), jnp.float32)
    bd1 = sc * jax.random.normal(ks[5], (1, cr), jnp.float32)
    wd2 = sc * jax.random.normal(ks[6], (cr, n_feat), jnp.float32)
    bd2 = sc * jax.random.normal(ks[7], (1, n_feat), jnp.float32)
    return (w1, b1, w2, b2, wd1, bd1, wd2, bd2)


if __name__ == "__main__":
    key = jax.random.PRNGKey(0)

    def run_case(N, C, H, W, reduction, row_block):
        kx, kp = jax.random.split(jax.random.fold_in(key, H * 1000 + W))
        x = jax.random.normal(kx, (N, C, H, W), jnp.float32)
        params = make_params(kp, C, reduction)

        out = jax.block_until_ready(rcab_pallas(x, params, row_block=row_block))
        assert out.shape == (N, C, H, W)

        # Tight check vs. a reference using the same bf16 MXU input precision
        # (f32 accumulation, f32 residual path).
        ref_bf16 = rcab_reference(x, params, conv_dtype=jnp.bfloat16)
        diff_bf16 = jnp.max(jnp.abs(out - ref_bf16))
        assert jnp.allclose(out, ref_bf16, atol=3e-3, rtol=3e-3), (
            f"max abs diff vs bf16-matched reference: {diff_bf16}")

        # Loose sanity check vs. exact f32 PyTorch semantics (bf16 conv inputs
        # are the only deviation).
        ref_f32 = rcab_reference(x, params, conv_dtype=jnp.float32)
        diff_f32 = jnp.max(jnp.abs(out - ref_f32))
        assert jnp.allclose(out, ref_f32, atol=1e-1, rtol=1e-1), (
            f"max abs diff vs f32 reference: {diff_f32}")

    # nH=2: exercises the first/last halo blocks.
    run_case(N=2, C=32, H=16, W=16, reduction=8, row_block=8)
    # nH=3: also exercises a pure-interior halo block.
    run_case(N=1, C=32, H=24, W=24, reduction=8, row_block=8)

    print("KERNEL_OK")
</pallas_src>

<mosaic_0001>
module attributes {stable_mosaic.version = 11 : i64} {
  func.func @rcab_conv_kernel(%arg0: i32, %arg1: i32, %arg2: memref<1x20x18x32xbf16, #tpu.memory_space<vmem>>, %arg3: memref<288x32xbf16, #tpu.memory_space<vmem>>, %arg4: memref<1x32xf32, #tpu.memory_space<vmem>>, %arg5: memref<288x32xbf16, #tpu.memory_space<vmem>>, %arg6: memref<1x32xf32, #tpu.memory_space<vmem>>, %arg7: memref<1x128x32xf32, #tpu.memory_space<vmem>>, %arg8: memref<1x1x8x32xf32, #tpu.memory_space<vmem>>) attributes {dimension_semantics = [#tpu.dimension_semantics<parallel>, #tpu.dimension_semantics<parallel>], iteration_bounds = array<i64: 2, 2>, scalar_prefetch = 0 : i64, scratch_operands = 0 : i64, tpu.core_type = #tpu.core_type<tc>, window_params = [{transform_indices = @transform_0, window_bounds = array<i64: 1, 20, 18, 32>}, {pipeline_mode = #tpu.pipeline_mode<synchronous>, transform_indices = @transform_1, window_bounds = array<i64: 288, 32>}, {pipeline_mode = #tpu.pipeline_mode<synchronous>, transform_indices = @transform_2, window_bounds = array<i64: 1, 32>}, {pipeline_mode = #tpu.pipeline_mode<synchronous>, transform_indices = @transform_3, window_bounds = array<i64: 288, 32>}, {pipeline_mode = #tpu.pipeline_mode<synchronous>, transform_indices = @transform_4, window_bounds = array<i64: 1, 32>}, {transform_indices = @transform_5, window_bounds = array<i64: 1, 128, 32>}, {transform_indices = @transform_6, window_bounds = array<i64: 1, 1, 8, 32>}]} {
    %c8_i32 = arith.constant 8 : i32
    %0 = arith.muli %arg1, %c8_i32 : i32
    %1 = tpu.assume_multiple %0, 8 : i32
    %c0 = arith.constant 0 : index
    %2 = arith.index_cast %1 : i32 to index
    %c0_0 = arith.constant 0 : index
    %c0_1 = arith.constant 0 : index
    %3 = vector.load %arg2[%c0, %2, %c0_0, %c0_1] : memref<1x20x18x32xbf16, #tpu.memory_space<vmem>>, vector<1x12x18x32xbf16>
    %4 = vector.shape_cast %3 : vector<1x12x18x32xbf16> to vector<12x18x32xbf16>
    %5 = vector.extract_strided_slice %4 {offsets = [0, 0, 0], sizes = [10, 16, 32], strides = [1, 1, 1]} : vector<12x18x32xbf16> to vector<10x16x32xbf16>
    %6 = vector.shape_cast %5 : vector<10x16x32xbf16> to vector<160x32xbf16>
    %7 = vector.extract_strided_slice %4 {offsets = [0, 1, 0], sizes = [10, 16, 32], strides = [1, 1, 1]} : vector<12x18x32xbf16> to vector<10x16x32xbf16>
    %8 = vector.shape_cast %7 : vector<10x16x32xbf16> to vector<160x32xbf16>
    %9 = vector.extract_strided_slice %4 {offsets = [0, 2, 0], sizes = [10, 16, 32], strides = [1, 1, 1]} : vector<12x18x32xbf16> to vector<10x16x32xbf16>
    %10 = vector.shape_cast %9 : vector<10x16x32xbf16> to vector<160x32xbf16>
    %11 = vector.extract_strided_slice %4 {offsets = [1, 0, 0], sizes = [10, 16, 32], strides = [1, 1, 1]} : vector<12x18x32xbf16> to vector<10x16x32xbf16>
    %12 = vector.shape_cast %11 : vector<10x16x32xbf16> to vector<160x32xbf16>
    %13 = vector.extract_strided_slice %4 {offsets = [1, 1, 0], sizes = [10, 16, 32], strides = [1, 1, 1]} : vector<12x18x32xbf16> to vector<10x16x32xbf16>
    %14 = vector.shape_cast %13 : vector<10x16x32xbf16> to vector<160x32xbf16>
    %15 = vector.extract_strided_slice %4 {offsets = [1, 2, 0], sizes = [10, 16, 32], strides = [1, 1, 1]} : vector<12x18x32xbf16> to vector<10x16x32xbf16>
    %16 = vector.shape_cast %15 : vector<10x16x32xbf16> to vector<160x32xbf16>
    %17 = vector.extract_strided_slice %4 {offsets = [2, 0, 0], sizes = [10, 16, 32], strides = [1, 1, 1]} : vector<12x18x32xbf16> to vector<10x16x32xbf16>
    %18 = vector.shape_cast %17 : vector<10x16x32xbf16> to vector<160x32xbf16>
    %19 = vector.extract_strided_slice %4 {offsets = [2, 1, 0], sizes = [10, 16, 32], strides = [1, 1, 1]} : vector<12x18x32xbf16> to vector<10x16x32xbf16>
    %20 = vector.shape_cast %19 : vector<10x16x32xbf16> to vector<160x32xbf16>
    %21 = vector.extract_strided_slice %4 {offsets = [2, 2, 0], sizes = [10, 16, 32], strides = [1, 1, 1]} : vector<12x18x32xbf16> to vector<10x16x32xbf16>
    %22 = vector.shape_cast %21 : vector<10x16x32xbf16> to vector<160x32xbf16>
    %23 = tpu.concatenate %6, %8, %10, %12, %14, %16, %18, %20, %22 in 1 : vector<160x32xbf16>, vector<160x32xbf16>, vector<160x32xbf16>, vector<160x32xbf16>, vector<160x32xbf16>, vector<160x32xbf16>, vector<160x32xbf16>, vector<160x32xbf16>, vector<160x32xbf16> -> vector<160x288xbf16>
    %c0_2 = arith.constant 0 : index
    %c0_3 = arith.constant 0 : index
    %24 = vector.load %arg3[%c0_2, %c0_3] : memref<288x32xbf16, #tpu.memory_space<vmem>>, vector<288x32xbf16>
    %cst = arith.constant dense<0.000000e+00> : vector<160x32xf32>
    %25 = tpu.matmul %23, %24, %cst {dimension_numbers = #tpu.dot_dimension_numbers<[1], [0], [0], [1], [0, 0, 1, 1], [], []>} : vector<160x288xbf16>, vector<288x32xbf16>, vector<160x32xf32> -> vector<160x32xf32>
    %c0_4 = arith.constant 0 : index
    %c0_5 = arith.constant 0 : index
    %26 = vector.load %arg4[%c0_4, %c0_5] : memref<1x32xf32, #tpu.memory_space<vmem>>, vector<1x32xf32>
    %27 = vector.broadcast %26 : vector<1x32xf32> to vector<160x32xf32>
    %28 = arith.addf %25, %27 : vector<160x32xf32>
    %cst_6 = arith.constant 0.000000e+00 : f32
    %29 = vector.broadcast %cst_6 : f32 to vector<160x32xf32>
    %30 = arith.maximumf %28, %29 : vector<160x32xf32>
    %31 = vector.shape_cast %30 : vector<160x32xf32> to vector<10x16x32xf32>
    %c1_i32 = arith.constant 1 : i32
    %32 = arith.subi %1, %c1_i32 : i32
    %33 = tpu.iota {dimensions = array<i32: 0>} : vector<10x1x1xi32>
    %34 = vector.broadcast %32 : i32 to vector<10x1x1xi32>
    %35 = arith.addi %34, %33 : vector<10x1x1xi32>
    %c0_i32 = arith.constant 0 : i32
    %36 = vector.broadcast %c0_i32 : i32 to vector<10x1x1xi32>
    %37 = arith.cmpi sge, %35, %36 : vector<10x1x1xi32>
    %c15_i32 = arith.constant 15 : i32
    %38 = vector.broadcast %c15_i32 : i32 to vector<10x1x1xi32>
    %39 = arith.cmpi sle, %35, %38 : vector<10x1x1xi32>
    %40 = arith.andi %37, %39 : vector<10x1x1xi1>
    %cst_7 = arith.constant 0.000000e+00 : f32
    %41 = vector.shape_cast %40 : vector<10x1x1xi1> to vector<10x1x1xi1>
    %42 = vector.broadcast %41 : vector<10x1x1xi1> to vector<10x16x32xi1>
    %43 = vector.broadcast %cst_7 : f32 to vector<10x16x32xf32>
    %44 = arith.select %42, %31, %43 : vector<10x16x32xi1>, vector<10x16x32xf32>
    %45 = arith.truncf %44 : vector<10x16x32xf32> to vector<10x16x32xbf16>
    %cst_8 = arith.constant 0.000000e+00 : bf16
    %46 = vector.broadcast %cst_8 : bf16 to vector<10x1x32xbf16>
    %47 = tpu.concatenate %46, %45, %46 in 1 : vector<10x1x32xbf16>, vector<10x16x32xbf16>, vector<10x1x32xbf16> -> vector<10x18x32xbf16>
    %48 = vector.extract_strided_slice %47 {offsets = [0, 0, 0], sizes = [8, 16, 32], strides = [1, 1, 1]} : vector<10x18x32xbf16> to vector<8x16x32xbf16>
    %49 = vector.shape_cast %48 : vector<8x16x32xbf16> to vector<128x32xbf16>
    %50 = vector.extract_strided_slice %47 {offsets = [0, 1, 0], sizes = [8, 16, 32], strides = [1, 1, 1]} : vector<10x18x32xbf16> to vector<8x16x32xbf16>
    %51 = vector.shape_cast %50 : vector<8x16x32xbf16> to vector<128x32xbf16>
    %52 = vector.extract_strided_slice %47 {offsets = [0, 2, 0], sizes = [8, 16, 32], strides = [1, 1, 1]} : vector<10x18x32xbf16> to vector<8x16x32xbf16>
    %53 = vector.shape_cast %52 : vector<8x16x32xbf16> to vector<128x32xbf16>
    %54 = vector.extract_strided_slice %47 {offsets = [1, 0, 0], sizes = [8, 16, 32], strides = [1, 1, 1]} : vector<10x18x32xbf16> to vector<8x16x32xbf16>
    %55 = vector.shape_cast %54 : vector<8x16x32xbf16> to vector<128x32xbf16>
    %56 = vector.extract_strided_slice %47 {offsets = [1, 1, 0], sizes = [8, 16, 32], strides = [1, 1, 1]} : vector<10x18x32xbf16> to vector<8x16x32xbf16>
    %57 = vector.shape_cast %56 : vector<8x16x32xbf16> to vector<128x32xbf16>
    %58 = vector.extract_strided_slice %47 {offsets = [1, 2, 0], sizes = [8, 16, 32], strides = [1, 1, 1]} : vector<10x18x32xbf16> to vector<8x16x32xbf16>
    %59 = vector.shape_cast %58 : vector<8x16x32xbf16> to vector<128x32xbf16>
    %60 = vector.extract_strided_slice %47 {offsets = [2, 0, 0], sizes = [8, 16, 32], strides = [1, 1, 1]} : vector<10x18x32xbf16> to vector<8x16x32xbf16>
    %61 = vector.shape_cast %60 : vector<8x16x32xbf16> to vector<128x32xbf16>
    %62 = vector.extract_strided_slice %47 {offsets = [2, 1, 0], sizes = [8, 16, 32], strides = [1, 1, 1]} : vector<10x18x32xbf16> to vector<8x16x32xbf16>
    %63 = vector.shape_cast %62 : vector<8x16x32xbf16> to vector<128x32xbf16>
    %64 = vector.extract_strided_slice %47 {offsets = [2, 2, 0], sizes = [8, 16, 32], strides = [1, 1, 1]} : vector<10x18x32xbf16> to vector<8x16x32xbf16>
    %65 = vector.shape_cast %64 : vector<8x16x32xbf16> to vector<128x32xbf16>
    %66 = tpu.concatenate %49, %51, %53, %55, %57, %59, %61, %63, %65 in 1 : vector<128x32xbf16>, vector<128x32xbf16>, vector<128x32xbf16>, vector<128x32xbf16>, vector<128x32xbf16>, vector<128x32xbf16>, vector<128x32xbf16>, vector<128x32xbf16>, vector<128x32xbf16> -> vector<128x288xbf16>
    %c0_9 = arith.constant 0 : index
    %c0_10 = arith.constant 0 : index
    %67 = vector.load %arg5[%c0_9, %c0_10] : memref<288x32xbf16, #tpu.memory_space<vmem>>, vector<288x32xbf16>
    %cst_11 = arith.constant dense<0.000000e+00> : vector<128x32xf32>
    %68 = tpu.matmul %66, %67, %cst_11 {dimension_numbers = #tpu.dot_dimension_numbers<[1], [0], [0], [1], [0, 0, 1, 1], [], []>} : vector<128x288xbf16>, vector<288x32xbf16>, vector<128x32xf32> -> vector<128x32xf32>
    %c0_12 = arith.constant 0 : index
    %c0_13 = arith.constant 0 : index
    %69 = vector.load %arg6[%c0_12, %c0_13] : memref<1x32xf32, #tpu.memory_space<vmem>>, vector<1x32xf32>
    %70 = vector.broadcast %69 : vector<1x32xf32> to vector<128x32xf32>
    %71 = arith.addf %68, %70 : vector<128x32xf32>
    %c0_14 = arith.constant 0 : index
    %c0_15 = arith.constant 0 : index
    %c0_16 = arith.constant 0 : index
    %72 = vector.load %arg7[%c0_14, %c0_15, %c0_16] : memref<1x128x32xf32, #tpu.memory_space<vmem>>, vector<1x128x32xf32>
    %73 = vector.shape_cast %72 : vector<1x128x32xf32> to vector<128x32xf32>
    %74 = vector.shape_cast %71 : vector<128x32xf32> to vector<1x128x32xf32>
    tpu.vector_store %arg7[%c0_14, %c0_15, %c0_16], %74 {strides = array<i32>} : memref<1x128x32xf32, #tpu.memory_space<vmem>>, vector<1x128x32xf32>,
    %75 = vector.shape_cast %71 : vector<128x32xf32> to vector<16x8x32xf32>
    %cst_17 = arith.constant dense<0.000000e+00> : vector<8x32xf32>
    %76 = vector.multi_reduction <add>, %75, %cst_17 [0] : vector<16x8x32xf32> to vector<8x32xf32>
    %77 = vector.shape_cast %76 : vector<8x32xf32> to vector<1x8x32xf32>
    %c0_18 = arith.constant 0 : index
    %c0_19 = arith.constant 0 : index
    %c0_20 = arith.constant 0 : index
    %c0_21 = arith.constant 0 : index
    %78 = vector.load %arg8[%c0_18, %c0_19, %c0_20, %c0_21] : memref<1x1x8x32xf32, #tpu.memory_space<vmem>>, vector<1x1x8x32xf32>
    %79 = vector.shape_cast %78 : vector<1x1x8x32xf32> to vector<1x8x32xf32>
    %80 = vector.shape_cast %77 : vector<1x8x32xf32> to vector<1x1x8x32xf32>
    tpu.vector_store %arg8[%c0_18, %c0_19, %c0_20, %c0_21], %80 {strides = array<i32>} : memref<1x1x8x32xf32, #tpu.memory_space<vmem>>, vector<1x1x8x32xf32>,
    return
  }
  func.func @transform_0(%arg0: i32, %arg1: i32) -> (i32, i32, i32, i32) {
    %c0_i32 = arith.constant 0 : i32
    %c0_i32_0 = arith.constant 0 : i32
    %c0_i32_1 = arith.constant 0 : i32
    %c0_i32_2 = arith.constant 0 : i32
    return %arg0, %c0_i32, %c0_i32_0, %c0_i32_1 : i32, i32, i32, i32
  }
  func.func @transform_1(%arg0: i32, %arg1: i32) -> (i32, i32) {
    %c0_i32 = arith.constant 0 : i32
    %c0_i32_0 = arith.constant 0 : i32
    %c0_i32_1 = arith.constant 0 : i32
    return %c0_i32, %c0_i32_0 : i32, i32
  }
  func.func @transform_2(%arg0: i32, %arg1: i32) -> (i32, i32) {
    %c0_i32 = arith.constant 0 : i32
    %c0_i32_0 = arith.constant 0 : i32
    %c0_i32_1 = arith.constant 0 : i32
    return %c0_i32, %c0_i32_0 : i32, i32
  }
  func.func @transform_3(%arg0: i32, %arg1: i32) -> (i32, i32) {
    %c0_i32 = arith.constant 0 : i32
    %c0_i32_0 = arith.constant 0 : i32
    %c0_i32_1 = arith.constant 0 : i32
    return %c0_i32, %c0_i32_0 : i32, i32
  }
  func.func @transform_4(%arg0: i32, %arg1: i32) -> (i32, i32) {
    %c0_i32 = arith.constant 0 : i32
    %c0_i32_0 = arith.constant 0 : i32
    %c0_i32_1 = arith.constant 0 : i32
    return %c0_i32, %c0_i32_0 : i32, i32
  }
  func.func @transform_5(%arg0: i32, %arg1: i32) -> (i32, i32, i32) {
    %c0_i32 = arith.constant 0 : i32
    %c0_i32_0 = arith.constant 0 : i32
    return %arg0, %arg1, %c0_i32 : i32, i32, i32
  }
  func.func @transform_6(%arg0: i32, %arg1: i32) -> (i32, i32, i32, i32) {
    %c0_i32 = arith.constant 0 : i32
    %c0_i32_0 = arith.constant 0 : i32
    %c0_i32_1 = arith.constant 0 : i32
    return %arg0, %arg1, %c0_i32, %c0_i32_0 : i32, i32, i32, i32
  }
}

</mosaic_0001>

<bundles_post_ra>
// kernel: tpu_custom_call.1
= control target key start
LH: loop header
LB: loop body
LE: loop exit
PB: predicated region body
PF: predicated region fallthrough
CT: control target
= control target key end

     0   :  { %12 = vsyncpa [#allocation3], 0  ;;  %s4636_s0 = inlined_call_operand.vmem [shape: bf16[2,20,18,32], index: 0, kind: input, shape index: {}]   ;;  %s4637_s1 = inlined_call_operand.vmem [shape: bf16[288,32], index: 1, kind: input, shape index: {}]   ;;  %s4638_s2 = inlined_call_operand.vmem [shape: f32[1,32], index: 2, kind: input, shape index: {}]   ;;  %s4639_s3 = inlined_call_operand.vmem [shape: bf16[288,32], index: 3, kind: input, shape index: {}]   ;;  %s4640_s4 = inlined_call_operand.vmem [shape: f32[1,32], index: 4, kind: input, shape index: {}]   ;;  %s4641_s5 = inlined_call_operand.vmem [shape: f32[2,256,32], index: 5, kind: output, shape index: {0}]   ;;  %s4642_s6 = inlined_call_operand.hbm [shape: f32[2,2,8,32], index: 6, kind: output, shape index: {1}]  }
   0x1   :  { %14 = vsyncpa [#allocation3 + $0x1], 0  ;;  %s3302_s21 = smov 0   ;;  %s3304_s22 = smov 0  }
   0x2   :  { %s3306_s23 = smov 0   ;;  %s3308_s24 = smov 0  }
   0x3   :  { %s3310_s25 = smov 0   ;;  %s3312_s26 = smov 0  }
   0x4   :  { %s3314_s27 = smov 0   ;;  %s3316_s28 = smov 0  }
   0x5 LB: > { %s2710_s29 = sadd.s32 4294967295, %s3261_s28   ;;  %s2711_s30 = sadd.s32 4294967294, %s3261_s28   ;;  %s3261_s28 = sphi %s3316_s28, %s20_s28   ;;  %s3257_s27 = sphi %s3314_s27, %s4666_s27   ;;  %s3253_s26 = sphi %s3312_s26, %s4665_s26   ;;  %s3249_s25 = sphi %s3310_s25, %s4664_s25   ;;  %s3245_s24 = sphi %s3308_s24, %s4663_s24   ;;  %s3241_s23 = sphi %s3306_s23, %s4662_s23   ;;  %s3237_s22 = sphi %s3304_s22, %s4661_s22   ;;  %s3233_s21 = sphi %s3302_s21, %s4660_s21  }
   0x6   : > { %s29_s7 = sadd.s32 1, %s3253_s26  ;;  %s32_s8 = sadd.s32 1, %s3257_s27 }
   0x7   : > { %p30_p0 = scmp.ge.s32.totalorder %s29_s7, 2  ;;  %p189_p1 = scmp.ne.s32.totalorder %s3241_s23, %s3237_s22 }
   0x8   : > { %p190_p2 = scmp.eq.s32.totalorder %s2710_s29, 3  ;;  %p195_p5 = scmp.ne.s32.totalorder %s3237_s22, %s3233_s21 }
   0x9   : > { %s4668_s7 = smov (%p30_p0, %s29_s7), 0  ;;  %s4670_s8 = smov (!%p30_p0, %s32_s8), %s3257_s27 }
   0xa   : > { %4647 = sst [smem:[#allocation5_spill]] %s4668_s7  ;;  %s175_s9 = ssub.s32 %s3253_s26, %s4668_s7 }
   0xb   : > { %p3353_p3 = por %p190_p2, %p189_p1  ;;  %p34_p4 = scmp.ge.s32.totalorder %s4670_s8, 2 }
   0xc   : > { %p196_p6 = scmp.eq.s32.totalorder %s2711_s30, 3  ;;  %p2714_p7 = scmp.ge.s32.totalorder %s3261_s28, 1 }
   0xd   : > { %s4672_s8 = smov (%p34_p4, %s4670_s8), 0  ;;  %p234_p9 = scmp.lt.s32.totalorder %s3261_s28, 5 }
   0xe   : > { %4649 = sst [smem:[#allocation6_spill]] %s4672_s8  ;;  %p3362_p8 = por %p196_p6, %p195_p5 }
   0xf   : > { %s174_s12 = ssub.s32 %s3257_s27, %s4672_s8  ;;  %s179_s13 = sadd.s32 1, %s3241_s23 }
  0x10   : > { %s176_s14 = sor.u32 %s175_s9, %s174_s12  ;;  %p235_p10 = pnand %p2714_p7, %p234_p9 }
  0x11   : > { %p177_p11 = scmp.eq.s32.totalorder %s176_s14, 0  ;;  %p273_p12 = scmp.lt.s32.totalorder (!%p235_p10), %s3249_s25, 1  ;;  %v3129_v0 = vld [vmem:[%s4637_s1 + $0x40] sm:$0xff] (!%p235_p10)   ;;  %v3131_v2 = vld [vmem:[%s4637_s1 + $0x48] sm:$0xff] (!%p235_p10)   ;;  %vm602_vm0 = vcmask (!%p235_p10), 1042432   ;;  %v3133_v4 = vld [vmem:[%s4637_s1 + $0x50] sm:$0xff] (!%p235_p10)  }
  0x12   : > { %238 = sbr.rel (%p235_p10) target bundleno = 886 (0x376), region = 40  ;;  %v3130_v1 = vld [vmem:[%s4637_s1] sm:$0xff] (!%p235_p10)   ;;  %2834 = vmatprep.subr.bf16.mxu0 (!%p235_p10), %v3129_v0  ;;  %v3132_v3 = vld [vmem:[%s4637_s1 + $0x8] sm:$0xff] (!%p235_p10)   ;;  %vm603_vm1 = vcmask (!%p235_p10), 1046532   ;;  %v3134_v13 = vld [vmem:[%s4637_s1 + $0x10] sm:$0xff] (!%p235_p10)   ;;  %s3263_s9 = smov (!%p235_p10), 64  }
  0x13   : > { %s3371_s15 = scalar_select %p177_p11, %s3241_s23, %s179_s13  }
  0x14   : > { %s2833_s19 = smul.u32 (!%p235_p10), 96, %s3245_s24  ;;  %2835 = vmatpush3.bf16.msra.mxu0 (!%p235_p10), %v3130_v1  ;;  %vm329_vm2 = vsmask.f32 (!%p235_p10), 3328  ;;  %vm330_vm3 = vsmask.f32 (!%p235_p10), 7440  ;;  %v3136_v19 = vld [vmem:[%s4637_s1 + $0x58] sm:$0xff] (!%p235_p10)   ;;  %vm3446_vm4 = vmor (!%p235_p10), %vm602_vm0, %vm603_vm1 }
  0x15   : > { %2836 = vmatprep.subr.bf16.mxu0 (!%p235_p10), %v3131_v2  ;;  %v3137_v25 = vld [vmem:[%s4637_s1 + $0x18] sm:$0xff] (!%p235_p10)   ;;  %vm971_vm5 = vcmask (!%p235_p10), 261120   ;;  %v3138_v31 = vld [vmem:[%s4637_s1 + $0x60] sm:$0xff] (!%p235_p10)   ;;  %s4645_s18 = smov (!%p235_p10), 96   ;;  %v3140_v59 = vld [vmem:[%s4637_s1 + $0x68] sm:$0xff] (!%p235_p10)   ;;  %vm1002_vm7 = vcmask (!%p235_p10), 523264  }
  0x16   : > { %v3139_v54 = vld [vmem:[%s4637_s1 + $0x20] sm:$0xff] (!%p235_p10)   ;;  %vm3522_vm6 = vmor (!%p235_p10), %vm329_vm2, %vm330_vm3  ;;  %vm1023_vm8 = vcmask (!%p235_p10), 785408   ;;  %s2720_s13 = sshll.u32 (!%p235_p10), %s3245_s24, 3  ;;  %vm1742_vm12 = vcmask (!%p235_p10), 1040384   ;;  %vm1743_vm13 = vsmask.f32 (!%p235_p10), 256 }
  0x17   : > { %s2800_s14 = sadd.s32 (!%p235_p10), 4294967295, %s2720_s13  ;;  %vm4133_vm0 = vmand (!%p235_p10), %vm1742_vm12, %vm1743_vm13  ;;  %vm1878_vm2 = vcmask (!%p235_p10), 1046528   ;;  %s2829_s7 = sshll.u32 (!%p235_p10), %s3249_s25, 1 }
  0x18   : > { %2837 = vmatpush3.bf16.msra.mxu0 (!%p235_p10), %v3132_v3  ;;  %s3266_s17 = smov (!%p235_p10), [#allocation2]  }
  0x19   : > { %s3375_s16 = scalar_select %p273_p12, %s3249_s25, 1  ;;  %2838 = vmatprep.subr.bf16.mxu0 %v3133_v4 }
  0x1b   : > { %s3044_s30 = smul.u32 240, %s3375_s16 }
  0x1c   : > { %2839 = vmatpush3.bf16.msra.mxu0 %v3134_v13 }
  0x1d   : > { %s277_s8 = scalar_lea.vmem %s4636_s0, %s3044_s30  ;;  %2840 = vmatprep.subr.bf16.mxu0 %v3136_v19  ;;  %s3265_s30 = smov 32  }
  0x1e   : > { %s3397_s29 = scalar_lea.vmem %s277_s8, %s2833_s19 }
  0x1f   : > { %v3400_v5 = vld [vmem:[%s3397_s29 + $0x18] sm:$0xf]  ;;  %v3403_v6 = vld [vmem:[%s3397_s29 + $0x1c] sm:$0xf]  ;;  %v3406_v7 = vld [vmem:[%s3397_s29 + $0x24] sm:$0xf] }
  0x20   : > { %v394_v8 = vshrl.u32 %v3403_v6, 16  ;;  %v3411_v9 = vcombine.low %v3400_v5, %v3403_v6  ;;  %v381_v10 = vshrl.u32 %v3400_v5, 16  ;;  %v384_v11 = vshll.u32 %v3400_v5, 16  ;;  %v3416_v12 = vld [vmem:[%s3397_s29 + $0x28] sm:$0xf]  ;;  %2841 = vmatpush3.bf16.msra.mxu0 %v3137_v25 }
  0x21   : > { %v418_v14 = vshrl.u32 %v3416_v12, 16  ;;  %v3424_v15 = vcombine.low %v3406_v7, %v3416_v12  ;;  %v405_v16 = vshrl.u32 %v3406_v7, 16  ;;  %v408_v17 = vshll.u32 %v3406_v7, 16  ;;  %v3429_v18 = vld [vmem:[%s3397_s29 + $0xc] sm:$0xf]  ;;  %2842 = vmatprep.subr.bf16.mxu0 %v3138_v31 }
  0x22   : > { %925 = vrot.lane.b32.xlu1 %v3411_v9, %s3263_s9  ;;  %v3437_v20 = vld [vmem:[%s3397_s29 + $0x10] sm:$0xf]  ;;  %v357_v21 = vshrl.u32 %v3429_v18, 16  ;;  %v360_v22 = vshll.u32 %v3429_v18, 16  ;;  %v3442_v23 = vld [vmem:[%s3397_s29 + $0x14] sm:$0x1] }
  0x23   : > { %927 = vrot.lane.b32.xlu0 %v3424_v15, %s3263_s9  ;;  %v370_v26 = vshrl.u32 %v3437_v20, 16  ;;  %v3458_v27 = vcombine.low %v3429_v18, %v3437_v20  ;;  %v2724_v28 = vrot.slane %v3429_v18, 9  ;;  %v614_v29 = vrot.slane %v3437_v20, 5  ;;  %v3463_v30 = vld [vmem:[%s3397_s29 + $0x20] sm:$0x1] }
  0x24   : > { %v617_v32 = vrot.slane %v3442_v23, 5  ;;  %v2725_v33 = vrot.slane %v3400_v5, 9  ;;  %v621_v34 = vrot.slane %v3403_v6, 5  ;;  %v624_v35 = vrot.slane %v3463_v30, 5  ;;  %v3473_v36 = vld [vmem:[%s3397_s29] sm:$0xf]  ;;  %2843 = vmatpush3.bf16.msra.mxu0 %v3139_v54 }
  0x25   : > { %v615_v37 = vsel %vm3446_vm4, %v2724_v28, %v614_v29  ;;  %v616_v38 = vrot.slane %v614_v29, 4  ;;  %v3478_v39 = vld [vmem:[%s3397_s29 + $0x4] sm:$0xf]  ;;  %v295_v40 = vld [vmem:[%s3397_s29 + $0x8] sm:$0x1]  ;;  %v2723_v41 = vrot.slane %v3473_v36, 9  ;;  %2844 = vmatprep.subr.bf16.mxu0 %v3140_v59 }
  0x26   : > { %876 = vrot.lane.b32.xlu1 %v3458_v27, %s4645_s18  ;;  %v622_v42 = vsel %vm3446_vm4, %v2725_v33, %v621_v34  ;;  %v623_v43 = vrot.slane %v621_v34, 4  ;;  %v607_v44 = vrot.slane %v3478_v39, 5  ;;  %v610_v45 = vrot.slane %v295_v40, 5  ;;  %v3141_v5 = vld [vmem:[%s4637_s1 + $0x28] sm:$0xff]   ;;  %v3575_v54 = vld [vmem:[%s3397_s29 + $0x30] sm:$0xf] }
  0x27   : > { %v618_v46 = vsel %vm3446_vm4, %v616_v38, %v617_v32  ;;  %v333_v47 = vshrl.u32 %v3473_v36, 16  ;;  %v336_v48 = vshll.u32 %v3473_v36, 16  ;;  %v342_v49 = vshll.u32 %v3478_v39, 16  ;;  %v3142_v32 = vld [vmem:[%s4637_s1 + $0x70] sm:$0xff]   ;;  %v3147_v59 = vld [vmem:[%s4637_s1 + $0x38] sm:$0xff]  }
  0x28   : > { %v3492_v50 = vcombine.low %v615_v37, %v618_v46  ;;  %v625_v51 = vsel %vm3446_vm4, %v623_v43, %v624_v35  ;;  %v608_v52 = vsel %vm3446_vm4, %v2723_v41, %v607_v44  ;;  %v609_v53 = vrot.slane %v607_v44, 4  ;;  %2845 = vmatpush3.bf16.msra.mxu0 %v3141_v5 }
  0x29   : > { %v3501_v55 = vcombine.low %v622_v42, %v625_v51  ;;  %v335_v56 = vrot.slane %v333_v47, 4  ;;  %v338_v57 = vrot.slane %v336_v48, 5  ;;  %v344_v58 = vrot.slane %v342_v49, 5  ;;  %2846 = vmatprep.subr.bf16.mxu0 %v3142_v32 }
  0x2a   : > { %902 = vrot.lane.b32.xlu0 %v3492_v50, %s3265_s30  ;;  %878 = vrot.lane.b32.xlu1 %v3411_v9, %s4645_s18  ;;  %v611_v60 = vsel %vm3446_vm4, %v609_v53, %v610_v45  ;;  %v346_v61 = vshrl.u32 %v3478_v39, 16  ;;  %v352_v62 = vshll.u32 %v295_v40, 16  ;;  %v383_v63 = vrot.slane %v381_v10, 4  ;;  %v3148_v45 = vld [vmem:[%s4637_s1 + $0x88] sm:$0xff]  }
  0x2b   : > { %v2755_v0 = vcombine.low %v608_v52, %v611_v60  ;;  %v339_v1 = vor.u32 %v338_v57, %v335_v56  ;;  %v386_v2 = vrot.slane %v384_v11, 5  ;;  %v390_v3 = vshll.u32 %v3403_v6, 16  ;;  %3000 = vmatprep.mubr.msk.bf16.mxu1 %vm971_vm5, %v3501_v55 }
  0x2c   : > { %v348_v13 = vrot.slane %v346_v61, 4  ;;  %v354_v19 = vrot.slane %v352_v62, 5  ;;  %v396_v10 = vrot.slane %v394_v8, 4  ;;  %v400_v25 = vshll.u32 %v3463_v30, 16 }
  0x2d   : > { %v340_v11 = vrot.slane %v339_v1, 4  ;;  %v387_v28 = vor.u32 %v386_v2, %v383_v63  ;;  %v392_v29 = vrot.slane %v390_v3, 5  ;;  %v359_v31 = vrot.slane %v357_v21, 4  ;;  %v3146_v21 = vld [vmem:[%s4637_s1 + $0x80] sm:$0xff]  }
  0x2e   : > { %904 = vrot.lane.b32.xlu0 %v3501_v55, %s3265_s30  ;;  %853 = vrot.lane.b32.xlu1 %v2755_v0, %s3263_s9  ;;  %v349_v6 = vor.u32 %v348_v13, %v344_v58  ;;  %v402_v8 = vrot.slane %v400_v25, 5  ;;  %v362_v30 = vrot.slane %v360_v22, 5  ;;  %v366_v33 = vshll.u32 %v3437_v20, 16  ;;  %v3143_v22 = vld [vmem:[%s4637_s1 + $0x30] sm:$0xff]   ;;  %v307_v25 = vld [vmem:[%s3397_s29 + $0x38] sm:$0x1] }
  0x2f   : > { %v345_v34 = vsel %vm3522_vm6, %v340_v11, %v344_v58  ;;  %v388_v35 = vrot.slane %v387_v28, 4  ;;  %v397_v37 = vor.u32 %v396_v10, %v392_v29  ;;  %v372_v38 = vrot.slane %v370_v26, 4  ;;  %2996 = vmatprep.subr.bf16.mxu1 %v3146_v21  ;;  %2847 = vmatpush3.bf16.msra.mxu0 %v3143_v22  ;;  %v306_v0 = vld [vmem:[%s3397_s29 + $0x34] sm:$0xf] }
  0x30   : > { %v350_v40 = vrot.slane %v349_v6, 4  ;;  %v363_v41 = vor.u32 %v362_v30, %v359_v31  ;;  %v368_v42 = vrot.slane %v366_v33, 5  ;;  %v376_v18 = vshll.u32 %v3442_v23, 16  ;;  %v3145_v23 = vld [vmem:[%s4637_s1 + $0x78] sm:$0xff]   ;;  %2997 = vmatpush3.bf16.msra.mxu1 %v3146_v21 }
  0x31   : > { %v393_v43 = vsel %vm3522_vm6, %v388_v35, %v392_v29  ;;  %v398_v44 = vrot.slane %v397_v37, 4  ;;  %v407_v20 = vrot.slane %v405_v16, 4  ;;  %v410_v26 = vrot.slane %v408_v17, 5  ;;  %v304_v17 = vld [vmem:[%s3397_s29 + $0x2c] sm:$0x1]  ;;  %2998 = vmatprep.subr.bf16.mxu1 %v3148_v45  ;;  %2848 = vmatprep.subr.bf16.mxu0 %v3145_v23 }
  0x32   : > { %v355_v46 = vsel %vm3522_vm6, %v350_v40, %v354_v19  ;;  %855 = vrot.lane.b32.xlu1 %v3492_v50, %s3263_s9  ;;  %v364_v16 = vrot.slane %v363_v41, 4  ;;  %v373_v47 = vor.u32 %v372_v38, %v368_v42  ;;  %v378_v48 = vrot.slane %v376_v18, 5  ;;  %v3600_v29 = vld [vmem:[%s3397_s29 + $0x3c] sm:$0xf]  ;;  %v309_v40 = vld [vmem:[%s3397_s29 + $0x40] sm:$0xf] }
  0x33   : > { %v2745_v49 = vcombine.low %v345_v34, %v355_v46  ;;  %v403_v51 = vsel %vm3522_vm6, %v398_v44, %v402_v8  ;;  %v411_v52 = vor.u32 %v410_v26, %v407_v20  ;;  %v414_v53 = vshll.u32 %v3416_v12, 16  ;;  %2849 = vmatpush3.bf16.msra.mxu0 %v3147_v59 }
  0x34   : > { %v3577_v56 = vcombine.low %v393_v43, %v403_v51  ;;  %v369_v50 = vsel %vm3522_vm6, %v364_v16, %v368_v42  ;;  %v374_v57 = vrot.slane %v373_v47, 4  ;;  %v420_v58 = vrot.slane %v418_v14, 4  ;;  %2999 = vmatpush3.bf16.msra.mxu1 %v3148_v45  ;;  %v310_v16 = vld [vmem:[%s3397_s29 + $0x44] sm:$0x1] }
  0x35   : > { %803 = vrot.lane.b32.xlu0 %v2745_v49, %s3265_s30  ;;  %v412_v60 = vrot.slane %v411_v52, 4  ;;  %v416_v61 = vrot.slane %v414_v53, 5  ;;  %v424_v62 = vshll.u32 %v304_v17, 16  ;;  %v2726_v63 = vrot.slane %v3406_v7, 9 }
  0x36   : > { %v379_v1 = vsel %vm3522_vm6, %v374_v57, %v378_v48  ;;  %v628_v14 = vrot.slane %v3416_v12, 5  ;;  %v631_v2 = vrot.slane %v304_v17, 5  ;;  %v429_v3 = vshrl.u32 %v3575_v54, 16 }
  0x37   : > { %v3593_v13 = vcombine.low %v369_v50, %v379_v1  ;;  %v421_v19 = vor.u32 %v420_v58, %v416_v61  ;;  %v426_v10 = vrot.slane %v424_v62, 5  ;;  %v432_v11 = vshll.u32 %v3575_v54, 16 }
  0x38   : > { %v629_v7 = vsel %vm3446_vm4, %v2726_v63, %v628_v14  ;;  %v630_v5 = vrot.slane %v628_v14, 4  ;;  %v442_v28 = vshrl.u32 %v306_v0, 16  ;;  %v417_v12 = vsel %vm3522_vm6, %v412_v60, %v416_v61 }
  0x39   : > { %948 = vrot.lane.b32.xlu0 %v3577_v56, %s4645_s18  ;;  %805 = vrot.lane.b32.xlu1 %v3593_v13, %s3265_s30  ;;  %v422_v31 = vrot.slane %v421_v19, 4  ;;  %v431_v32 = vrot.slane %v429_v3, 4  ;;  %v438_v6 = vshll.u32 %v306_v0, 16  ;;  %v434_v30 = vrot.slane %v432_v11, 5  ;;  %v3655_v3 = vld [vmem:[%s3397_s29 + $0x4c] sm:$0xf] }
  0x3a   : > { %v632_v8 = vsel %vm3446_vm4, %v630_v5, %v631_v2  ;;  %v444_v33 = vrot.slane %v442_v28, 4  ;;  %v448_v21 = vshll.u32 %v307_v25, 16  ;;  %v2727_v38 = vrot.slane %v3575_v54, 9 }
  0x3b   : > { %v427_v34 = vsel %vm3522_vm6, %v422_v31, %v426_v10  ;;  %v3612_v35 = vcombine.low %v629_v7, %v632_v8  ;;  %v440_v37 = vrot.slane %v438_v6, 5  ;;  %v435_v42 = vor.u32 %v434_v30, %v431_v32  ;;  %v3664_v7 = vld [vmem:[%s3397_s29 + $0x50] sm:$0x1] }
  0x3c   : > { %v3616_v41 = vcombine.low %v417_v12, %v427_v34  ;;  %v635_v18 = vrot.slane %v306_v0, 5  ;;  %v638_v43 = vrot.slane %v307_v25, 5  ;;  %v453_v44 = vshrl.u32 %v3600_v29, 16 }
  0x3d   : > { %807 = vrot.lane.b32.xlu1 %v3577_v56, %s3265_s30  ;;  %v445_v22 = vor.u32 %v444_v33, %v440_v37  ;;  %v456_v20 = vshll.u32 %v3600_v29, 16  ;;  %3001 = vmatmul.mubr.msk.bf16.vlgmr.msra.gmra.mrb[0].mxu1 %vm971_vm5, %v3612_v35  ;;  %v450_v26 = vrot.slane %v448_v21, 5  ;;  %v466_v46 = vshrl.u32 %v309_v40, 16 }
  0x3e   : > { %950 = vrot.lane.b32.xlu0 %v3616_v41, %s4645_s18  ;;  %v636_v23 = vsel %vm3446_vm4, %v2727_v38, %v635_v18  ;;  %v637_v45 = vrot.slane %v635_v18, 4  ;;  %v436_v47 = vrot.slane %v435_v42, 4  ;;  %v455_v17 = vrot.slane %v453_v44, 4  ;;  %v3687_v38 = vld [vmem:[%s3397_s29 + $0x54] sm:$0xf] }
  0x3f   : > { %v446_v48 = vrot.slane %v445_v22, 4  ;;  %v458_v49 = vrot.slane %v456_v20, 5  ;;  %v462_v52 = vshll.u32 %v309_v40, 16  ;;  %v3634_v53 = vcombine.low %v3575_v54, %v306_v0  ;;  %v3646_v0 = vld [vmem:[%s3397_s29 + $0x48] sm:$0xf] }
  0x40   : > { %v639_v51 = vsel %vm3446_vm4, %v637_v45, %v638_v43  ;;  %v468_v57 = vrot.slane %v466_v46, 4  ;;  %v2728_v60 = vrot.slane %v3600_v29, 9  ;;  %v642_v61 = vrot.slane %v309_v40, 5  ;;  %v3690_v42 = vld [vmem:[%s3397_s29 + $0x58] sm:$0xf] }
  0x41   : > { %857 = vrot.lane.b32.xlu1 %v3501_v55, %s3263_s9  ;;  %v3636_v50 = vcombine.low %v636_v23, %v639_v51  ;;  %v459_v58 = vor.u32 %v458_v49, %v455_v17  ;;  %v464_v59 = vrot.slane %v462_v52, 5  ;;  %v441_v62 = vsel %vm3522_vm6, %v436_v47, %v440_v37  ;;  %v316_v23 = vld [vmem:[%s3397_s29 + $0x5c] sm:$0x1] }
  0x42   : > { %906 = vrot.lane.b32.xlu0 %v3612_v35, %s3265_s30  ;;  %v451_v55 = vsel %vm3522_vm6, %v446_v48, %v450_v26  ;;  %v472_v54 = vshll.u32 %v310_v16, 16  ;;  %v645_v63 = vrot.slane %v310_v16, 5  ;;  %v643_v1 = vsel %vm3446_vm4, %v2728_v60, %v642_v61 }
  0x43   : > { %3004 = vmatprep.mubr.msk.bf16.mxu1 %vm971_vm5, %v3636_v50  ;;  %v644_v14 = vrot.slane %v642_v61, 4  ;;  %v469_v2 = vor.u32 %v468_v57, %v464_v59  ;;  %v3659_v19 = vcombine.low %v441_v62, %v451_v55  ;;  %v460_v10 = vrot.slane %v459_v58, 4 }
  0x44   : > { %v474_v5 = vrot.slane %v472_v54, 5  ;;  %v477_v28 = vshrl.u32 %v3646_v0, 16  ;;  %v2729_v12 = vrot.slane %v3646_v0, 9  ;;  %v480_v31 = vshll.u32 %v3646_v0, 16  ;;  %v3731_v54 = vld [vmem:[%s3397_s29 + $0x64] sm:$0xf] }
  0x45   : > { %880 = vrot.lane.b32.xlu1 %v3424_v15, %s4645_s18  ;;  %v646_v25 = vsel %vm3446_vm4, %v644_v14, %v645_v63  ;;  %v649_v32 = vrot.slane %v3655_v3, 5  ;;  %v470_v6 = vrot.slane %v469_v2, 4  ;;  %v490_v8 = vshrl.u32 %v3655_v3, 16 }
  0x46   : > { %929 = vrot.lane.b32.xlu0 %v3634_v53, %s3263_s9  ;;  %v3666_v11 = vcombine.low %v643_v1, %v646_v25  ;;  %v486_v30 = vshll.u32 %v3655_v3, 16  ;;  %v652_v33 = vrot.slane %v3664_v7, 5  ;;  %v3684_v37 = vcombine.low %v3600_v29, %v309_v40  ;;  %v3736_v1 = vld [vmem:[%s3397_s29 + $0x68] sm:$0x1] }
  0x47   : > { %v650_v21 = vsel %vm3446_vm4, %v2729_v12, %v649_v32  ;;  %v651_v34 = vrot.slane %v649_v32, 4  ;;  %v465_v18 = vsel %vm3522_vm6, %v460_v10, %v464_v59  ;;  %v479_v22 = vrot.slane %v477_v28, 4  ;;  %v3723_v59 = vld [vmem:[%s3397_s29 + $0x60] sm:$0xf] }
  0x48   : > { %3005 = vmatmul.mubr.msk.bf16.gmra.mrb[4].mxu1 %vm971_vm5, %v3666_v11  ;;  %v482_v43 = vrot.slane %v480_v31, 5  ;;  %v475_v20 = vsel %vm3522_vm6, %v470_v6, %v474_v5  ;;  %v3700_v29 = vrot.slane %v486_v30, 5  ;;  %v492_v40 = vrot.slane %v490_v8, 4 }
  0x49   : > { %809 = vrot.lane.b32.xlu1 %v3616_v41, %s3265_s30  ;;  %v653_v44 = vsel %vm3446_vm4, %v651_v34, %v652_v33  ;;  %v501_v45 = vshrl.u32 %v3687_v38, 16  ;;  %v504_v46 = vshll.u32 %v3687_v38, 16  ;;  %v2730_v16 = vrot.slane %v3687_v38, 9  ;;  %v3757_v34 = vld [vmem:[%s3397_s29 + $0x70] sm:$0xf] }
  0x4a   : > { %952 = vrot.lane.b32.xlu0 %v3659_v19, %s4645_s18  ;;  %v3702_v26 = vcombine.low %v650_v21, %v653_v44  ;;  %v514_v47 = vshrl.u32 %v3690_v42, 16  ;;  %v659_v48 = vrot.slane %v316_v23, 5  ;;  %v483_v17 = vor.u32 %v482_v43, %v479_v22  ;;  %v3754_v21 = vld [vmem:[%s3397_s29 + $0x6c] sm:$0xf] }
  0x4b   : > { %v510_v49 = vshll.u32 %v3690_v42, 16  ;;  %v3719_v57 = vcombine.low %v465_v18, %v475_v20  ;;  %v496_v58 = vshll.u32 %v3664_v7, 16  ;;  %v493_v60 = vor.u32 %v492_v40, %v3700_v29  ;;  %v3760_v18 = vld [vmem:[%s3397_s29 + $0x78] sm:$0xf]  ;;  %v3774_v20 = vld [vmem:[%s3397_s29 + $0x74] sm:$0x1] }
  0x4c   : > { %3008 = vmatprep.mubr.msk.bf16.mxu1 %vm971_vm5, %v3702_v26  ;;  %v503_v61 = vrot.slane %v501_v45, 4  ;;  %v506_v62 = vrot.slane %v504_v46, 5  ;;  %v484_v14 = vrot.slane %v483_v17, 4  ;;  %v516_v10 = vrot.slane %v514_v47, 4  ;;  %v3777_v40 = vld [vmem:[%s3397_s29 + $0x7c] sm:$0xf] }
  0x4d   : > { %859 = vrot.lane.b32.xlu1 %v3612_v35, %s3263_s9  ;;  %v656_v35 = vrot.slane %v3690_v42, 5  ;;  %v3738_v2 = vrot.slane %v510_v49, 5  ;;  %v2731_v25 = vrot.slane %v3723_v59, 9  ;;  %v663_v7 = vrot.slane %v3731_v54, 5 }
  0x4e   : > { %908 = vrot.lane.b32.xlu0 %v3636_v50, %s3265_s30  ;;  %v666_v5 = vrot.slane %v3736_v1, 5  ;;  %v494_v28 = vrot.slane %v493_v60, 4  ;;  %v498_v12 = vrot.slane %v496_v58, 5  ;;  %v507_v31 = vor.u32 %v506_v62, %v503_v61  ;;  %v3808_v60 = vld [vmem:[%s3397_s29 + $0x84] sm:$0xf] }
  0x4f   : > { %v657_v51 = vsel %vm3446_vm4, %v2730_v16, %v656_v35  ;;  %v658_v52 = vrot.slane %v656_v35, 4  ;;  %v520_v32 = vshll.u32 %v316_v23, 16  ;;  %v664_v6 = vsel %vm3446_vm4, %v2731_v25, %v663_v7  ;;  %v325_v35 = vld [vmem:[%s3397_s29 + $0x80] sm:$0x1] }
  0x50   : > { %v665_v8 = vrot.slane %v663_v7, 4  ;;  %v517_v30 = vor.u32 %v516_v10, %v3738_v2  ;;  %v525_v33 = vshrl.u32 %v3723_v59, 16  ;;  %v3766_v22 = vcombine.low %v3646_v0, %v3655_v3 }
  0x51   : > { %882 = vrot.lane.b32.xlu1 %v3634_v53, %s4645_s18  ;;  %v660_v55 = vsel %vm3446_vm4, %v658_v52, %v659_v48  ;;  %v489_v43 = vsel %vm3522_vm6, %v484_v14, %v3700_v29  ;;  %v3783_v23 = vrot.slane %v507_v31, 4  ;;  %v3785_v0 = vrot.slane %v520_v32, 5 }
  0x52   : > { %931 = vrot.lane.b32.xlu0 %v3684_v37, %s3263_s9  ;;  %v3733_v63 = vcombine.low %v657_v51, %v660_v55  ;;  %v667_v44 = vsel %vm3446_vm4, %v665_v8, %v666_v5  ;;  %v528_v29 = vshll.u32 %v3723_v59, 16  ;;  %v538_v45 = vshrl.u32 %v3731_v54, 16  ;;  %v3820_v5 = vld [vmem:[%s3397_s29 + $0x88] sm:$0xf] }
  0x53   : > { %v3787_v3 = vcombine.low %v664_v6, %v667_v44  ;;  %v2732_v46 = vrot.slane %v3754_v21, 9  ;;  %v670_v16 = vrot.slane %v3757_v34, 5  ;;  %v3794_v47 = vrot.slane %v517_v30, 4 }
  0x54   : > { %3009 = vmatmul.mubr.msk.bf16.gmra.mrb[8].mxu1 %vm971_vm5, %v3733_v63  ;;  %v3796_v48 = vrot.slane %v525_v33, 4  ;;  %v673_v17 = vrot.slane %v3774_v20, 5  ;;  %v676_v49 = vshrl.u32 %v3760_v18, 16  ;;  %v679_v58 = vshll.u32 %v3760_v18, 16 }
  0x55   : > { %811 = vrot.lane.b32.xlu1 %v3659_v19, %s3265_s30  ;;  %3012 = vmatprep.mubr.msk.bf16.mxu1 %vm971_vm5, %v3787_v3  ;;  %v671_v51 = vsel %vm3446_vm4, %v2732_v46, %v670_v16  ;;  %v672_v52 = vrot.slane %v670_v16, 4  ;;  %v689_v62 = vshrl.u32 %v3777_v40, 16  ;;  %v534_v14 = vshll.u32 %v3731_v54, 16 }
  0x56   : > { %954 = vrot.lane.b32.xlu0 %v3719_v57, %s4645_s18  ;;  %v678_v55 = vrot.slane %v676_v49, 4  ;;  %v681_v25 = vrot.slane %v679_v58, 5  ;;  %v685_v7 = vshll.u32 %v3777_v40, 16  ;;  %v695_v31 = vshll.u32 %v325_v35, 16 }
  0x57   : > { %v674_v10 = vsel %vm3446_vm4, %v672_v52, %v673_v17  ;;  %v2733_v32 = vrot.slane %v3760_v18, 9  ;;  %v3829_v6 = vcombine.low %v3687_v38, %v3690_v42  ;;  %v704_v33 = vrot.slane %v3777_v40, 5 }
  0x58   : > { %v682_v8 = vor.u32 %v681_v25, %v678_v55  ;;  %v687_v30 = vrot.slane %v685_v7, 5  ;;  %v697_v44 = vrot.slane %v695_v31, 5  ;;  %v710_v46 = vshrl.u32 %v3808_v60, 16 }
  0x59   : > { %861 = vrot.lane.b32.xlu1 %v3636_v50, %s3263_s9  ;;  %v499_v50 = vsel %vm3522_vm6, %v494_v28, %v498_v12  ;;  %v3822_v28 = vcombine.low %v671_v51, %v674_v10  ;;  %v691_v12 = vrot.slane %v689_v62, 4  ;;  %v705_v16 = vsel %vm3446_vm4, %v2733_v32, %v704_v33 }
  0x5a   : > { %910 = vrot.lane.b32.xlu0 %v3666_v11, %s3265_s30  ;;  %v3812_v61 = vcombine.low %v489_v43, %v499_v50  ;;  %v513_v43 = vsel %vm3522_vm6, %v3783_v23, %v3738_v2  ;;  %v707_v50 = vrot.slane %v325_v35, 5  ;;  %v683_v38 = vrot.slane %v682_v8, 4  ;;  %v3846_v2 = vld [vmem:[%s3397_s29 + $0x8c] sm:$0x1]  ;;  %s4657_s29 = smov 96  }
  0x5b   : > { %v692_v42 = vor.u32 %v691_v12, %v687_v30  ;;  %v706_v17 = vrot.slane %v704_v33, 4  ;;  %v530_v49 = vrot.slane %v528_v29, 5  ;;  %v540_v51 = vrot.slane %v538_v45, 4 }
  0x5c   : > { %3013 = vmatmul.mubr.msk.bf16.gmra.mrb[12].mxu1 %vm971_vm5, %v3822_v28  ;;  %v713_v52 = vshll.u32 %v3808_v60, 16  ;;  %v723_v58 = vshrl.u32 %v3820_v5, 16  ;;  %v523_v23 = vsel %vm3522_vm6, %v3794_v47, %v3785_v0  ;;  %v688_v35 = vsel %vm3522_vm6, %v683_v38, %v687_v30 }
  0x5d   : > { %884 = vrot.lane.b32.xlu1 %v3684_v37, %s4645_s18  ;;  %v693_v62 = vrot.slane %v692_v42, 4  ;;  %v708_v29 = vsel %vm3446_vm4, %v706_v17, %v707_v50  ;;  %v712_v55 = vrot.slane %v710_v46, 4  ;;  %v536_v25 = vrot.slane %v534_v14, 5 }
  0x5e   : > { %933 = vrot.lane.b32.xlu0 %v3766_v22, %s3263_s9  ;;  %v3860_v45 = vcombine.low %v705_v16, %v708_v29  ;;  %v715_v10 = vrot.slane %v713_v52, 5  ;;  %v725_v47 = vrot.slane %v723_v58, 4  ;;  %v729_v7 = vshll.u32 %v3846_v2, 16 }
  0x5f   : > { %v698_v0 = vsel %vm3522_vm6, %v693_v62, %v697_v44  ;;  %v3872_v8 = vcombine.low %v513_v43, %v523_v23  ;;  %v544_v14 = vshll.u32 %v3736_v1, 16  ;;  %v531_v30 = vor.u32 %v530_v49, %v3796_v48 }
  0x60   : > { %v3866_v12 = vcombine.low %v688_v35, %v698_v0  ;;  %v716_v31 = vor.u32 %v715_v10, %v712_v55  ;;  %3016 = vmatprep.mubr.msk.bf16.mxu1 %vm971_vm5, %v3860_v45  ;;  %v731_v50 = vrot.slane %v729_v7, 5  ;;  %v541_v46 = vor.u32 %v540_v51, %v536_v25 }
  0x61   : > { %813 = vrot.lane.b32.xlu1 %v3719_v57, %s3265_s30  ;;  %v546_v43 = vrot.slane %v544_v14, 5  ;;  %v532_v1 = vrot.slane %v531_v30, 4  ;;  %v549_v16 = vshrl.u32 %v3754_v21, 16  ;;  %v552_v48 = vshll.u32 %v3754_v21, 16 }
  0x62   : > { %956 = vrot.lane.b32.xlu0 %v3812_v61, %s4645_s18  ;;  %v717_v33 = vrot.slane %v716_v31, 4  ;;  %v542_v49 = vrot.slane %v541_v46, 4  ;;  %v562_v51 = vshrl.u32 %v3757_v34, 16  ;;  %v558_v52 = vshll.u32 %v3757_v34, 16 }
  0x63   : > { %v3896_v23 = vcombine.low %v3723_v59, %v3731_v54  ;;  %v551_v35 = vrot.slane %v549_v16, 4  ;;  %v554_v62 = vrot.slane %v552_v48, 5  ;;  %v537_v29 = vsel %vm3522_vm6, %v532_v1, %v536_v25 }
  0x64   : > { %v547_v55 = vsel %vm3522_vm6, %v542_v49, %v546_v43  ;;  %v560_v10 = vrot.slane %v558_v52, 5  ;;  %v568_v0 = vshll.u32 %v3774_v20, 16  ;;  %v3919_v31 = vcombine.low %v3754_v21, %v3757_v34 }
  0x65   : > { %863 = vrot.lane.b32.xlu1 %v3666_v11, %s3263_s9  ;;  %v719_v11 = vshll.u32 %v3820_v5, 16  ;;  %v555_v59 = vor.u32 %v554_v62, %v551_v35  ;;  %v738_v14 = vrot.slane %v3820_v5, 5  ;;  %v2734_v30 = vrot.slane %v3808_v60, 9 }
  0x66   : > { %912 = vrot.lane.b32.xlu0 %v3702_v26, %s3265_s30  ;;  %v570_v7 = vrot.slane %v568_v0, 5  ;;  %v741_v21 = vrot.slane %v3846_v2, 5  ;;  %v2765_v2 = vcombine.low %v3760_v18, %v3777_v40  ;;  %v2768_v18 = vcombine.low %v3808_v60, %v3820_v5 }
  0x67   : > { %v721_v32 = vrot.slane %v719_v11, 5  ;;  %v564_v11 = vrot.slane %v562_v51, 4  ;;  %v556_v25 = vrot.slane %v555_v59, 4  ;;  %v740_v4 = vrot.slane %v738_v14, 4 }
  0x68   : > { %v739_v34 = vsel %vm3446_vm4, %v2734_v30, %v738_v14 }
  0x69   : > { %886 = vrot.lane.b32.xlu1 %v3766_v22, %s4645_s18  ;;  %v726_v44 = vor.u32 %v725_v47, %v721_v32  ;;  %v722_v38 = vsel %vm3522_vm6, %v717_v33, %v721_v32  ;;  %v565_v54 = vor.u32 %v564_v11, %v560_v10  ;;  %v561_v20 = vsel %vm3522_vm6, %v556_v25, %v560_v10 }
  0x6a   : > { %935 = vrot.lane.b32.xlu0 %v3829_v6, %s3263_s9  ;;  %v742_v33 = vsel %vm3446_vm4, %v740_v4, %v741_v21 }
  0x6b   : > { %v727_v42 = vrot.slane %v726_v44, 4  ;;  %v566_v47 = vrot.slane %v565_v54, 4  ;;  %v2770_v44 = vcombine.low %v739_v34, %v742_v33 }
  0x6d   : > { %815 = vrot.lane.b32.xlu1 %v3812_v61, %s3265_s30  ;;  %v732_v17 = vsel %vm3522_vm6, %v727_v42, %v731_v50  ;;  %v571_v32 = vsel %vm3522_vm6, %v566_v47, %v570_v7  ;;  %3017 = vmatmul.mubr.msk.bf16.gmra.mrb[16].mxu1 %vm971_vm5, %v2770_v44  ;;  %vm1765_vm6 = vsmask.f32 7424 }
  0x6e   : > { %958 = vrot.lane.b32.xlu0 %v3872_v8, %s4645_s18  ;;  %v2769_v58 = vcombine.low %v722_v38, %v732_v17 }
  0x71   : > { %865 = vrot.lane.b32.xlu1 %v3702_v26, %s3263_s9  ;;  %v3906_v26 = vcombine.low %v537_v29, %v547_v55 }
  0x72   : > { %914 = vrot.lane.b32.xlu0 %v3733_v63, %s3265_s30 }
  0x75   : > { %888 = vrot.lane.b32.xlu1 %v3829_v6, %s4645_s18 }
  0x76   : > { %937 = vrot.lane.b32.xlu0 %v3896_v23, %s3263_s9 }
  0x79   : > { %817 = vrot.lane.b32.xlu1 %v3872_v8, %s3265_s30 }
  0x7a   : > { %960 = vrot.lane.b32.xlu0 %v3906_v26, %s4645_s18 }
  0x7d   : > { %867 = vrot.lane.b32.xlu1 %v3733_v63, %s3263_s9  ;;  %v3929_v63 = vcombine.low %v561_v20, %v571_v32 }
  0x7e   : > { %916 = vrot.lane.b32.xlu0 %v3787_v3, %s3265_s30 }
  0x81   : > { %890 = vrot.lane.b32.xlu1 %v3896_v23, %s4645_s18 }
  0x82   : > { %939 = vrot.lane.b32.xlu0 %v3919_v31, %s3263_s9 }
  0x85   : > { %819 = vrot.lane.b32.xlu1 %v3906_v26, %s3265_s30 }
  0x86   : > { %962 = vrot.lane.b32.xlu0 %v3929_v63, %s4645_s18 }
  0x89   : > { %869 = vrot.lane.b32.xlu1 %v3787_v3, %s3263_s9 }
  0x8a   : > { %918 = vrot.lane.b32.xlu0 %v3822_v28, %s3265_s30 }
  0x8d   : > { %892 = vrot.lane.b32.xlu1 %v3919_v31, %s4645_s18 }
  0x8e   : > { %941 = vrot.lane.b32.xlu0 %v2765_v2, %s3263_s9 }
  0x91   : > { %821 = vrot.lane.b32.xlu1 %v3929_v63, %s3265_s30 }
  0x92   : > { %964 = vrot.lane.b32.xlu0 %v3866_v12, %s4645_s18 }
  0x94   : > { %v926_v24 = vpop.permute.xlu1 %925 }
  0x95   : > { %871 = vrot.lane.b32.xlu1 %v3822_v28, %s3263_s9  ;;  %v928_v40 = vpop.permute.xlu0 %927  ;;  %v2735_v28 = vcombine.low %v3473_v36, %v3478_v39 }
  0x96   : > { %920 = vrot.lane.b32.xlu0 %v3860_v45, %s3265_s30 }
  0x98   : > { %v877_v3 = vpop.permute.xlu1 %876 }
  0x99   : > { %894 = vrot.lane.b32.xlu1 %v2765_v2, %s4645_s18 }
  0x9a   : > { %943 = vrot.lane.b32.xlu0 %v2768_v18, %s3263_s9 }
  0x9c   : > { %v903_v50 = vpop.permute.xlu0 %902  ;;  %v879_v46 = vpop.permute.xlu1 %878 }
  0x9d   : > { %v1056_v60 = vsel %vm971_vm5, %v3593_v13, %v903_v50 }
  0x9e   : > { %966 = vrot.lane.b32.xlu0 %v2769_v58, %s4645_s18  ;;  %v1085_v48 = vsel %vm1002_vm7, %v1056_v60, %v926_v24  ;;  %s3171_s18 = sshll.u32 %s3266_s17, 4  ;;  %s3172_s18 = int_to_ptr.vmem [resolvable:$false] %s3171_s18 }
  0xa0   : > { %v854_v38 = vpop.permute.xlu1 %853  ;;  %v905_v42 = vpop.permute.xlu0 %904 }
  0xa1   : > { %v1059_v36 = vsel %vm971_vm5, %v3577_v56, %v905_v42 }
  0xa2   : > { %v1087_v58 = vsel %vm1002_vm7, %v1059_v36, %v928_v40 }
  0xa4   : > { %v856_v43 = vpop.permute.xlu1 %855 }
  0xa7   : > { %v804_v45 = vpop.permute.xlu0 %803 }
  0xa8   : > { %v974_v5 = vsel %vm971_vm5, %v2735_v28, %v804_v45 }
  0xa9   : > { %v1004_v1 = vsel %vm1002_vm7, %v974_v5, %v854_v38 }
  0xaa   : > { %v1025_v39 = vsel %vm1023_vm8, %v1004_v1, %v877_v3 }
  0xab   : > { %v949_v16 = vpop.permute.xlu0 %948  ;;  %v806_v17 = vpop.permute.xlu1 %805 }
  0xac   : > { %v1105_v49 = vsel %vm1023_vm8, %v1085_v48, %v949_v16  ;;  %v977_v13 = vsel %vm971_vm5, %v3458_v27, %v806_v17 }
  0xad   : > { %1347 = vmatprep.mubr.bf16.mxu0 %v1105_v49  ;;  %v1006_v62 = vsel %vm1002_vm7, %v977_v13, %v856_v43 }
  0xae   : > { %1348 = vmatmul.mubr.bf16.vlgmr.msra.gmra.mrb[0].mxu0 %v1025_v39  ;;  %v1028_v56 = vsel %vm1023_vm8, %v1006_v62, %v879_v46 }
  0xaf   : > { %v808_v51 = vpop.permute.xlu1 %807 }
  0xb0   : > { %v951_v52 = vpop.permute.xlu0 %950  ;;  %v980_v59 = vsel %vm971_vm5, %v3411_v9, %v808_v51 }
  0xb1   : > { %v1108_v35 = vsel %vm1023_vm8, %v1087_v58, %v951_v52 }
  0xb2   : > { %1355 = vmatprep.mubr.bf16.mxu0 %v1108_v35 }
  0xb3   : > { %v858_v29 = vpop.permute.xlu1 %857 }
  0xb4   : > { %v907_v55 = vpop.permute.xlu0 %906  ;;  %v1008_v47 = vsel %vm1002_vm7, %v980_v59, %v858_v29 }
  0xb5   : > { %v1062_v27 = vsel %vm971_vm5, %v3616_v41, %v907_v55 }
  0xb6   : > { %1356 = vmatmul.mubr.bf16.gmra.mrb[4].mxu0 %v1028_v56 }
  0xb7   : > { %v881_v10 = vpop.permute.xlu1 %880 }
  0xb8   : > { %v930_v11 = vpop.permute.xlu0 %929  ;;  %v1031_v20 = vsel %vm1023_vm8, %v1008_v47, %v881_v10 }
  0xb9   : > { %v1089_v0 = vsel %vm1002_vm7, %v1062_v27, %v930_v11 }
  0xbb   : > { %v810_v54 = vpop.permute.xlu1 %809 }
  0xbc   : > { %v953_v25 = vpop.permute.xlu0 %952  ;;  %v983_v9 = vsel %vm971_vm5, %v3424_v15, %v810_v54 }
  0xbd   : > { %v1111_v7 = vsel %vm1023_vm8, %v1089_v0, %v953_v25 }
  0xbe   : > { %1363 = vmatprep.mubr.bf16.mxu0 %v1111_v7 }
  0xbf   : > { %1364 = vmatmul.mubr.bf16.gmra.mrb[8].mxu0 %v1031_v20  ;;  %v860_v32 = vpop.permute.xlu1 %859 }
  0xc0   : > { %v909_v14 = vpop.permute.xlu0 %908  ;;  %v1010_v44 = vsel %vm1002_vm7, %v983_v9, %v860_v32 }
  0xc1   : > { %v1065_v41 = vsel %vm971_vm5, %v3659_v19, %v909_v14 }
  0xc3   : > { %v883_v30 = vpop.permute.xlu1 %882 }
  0xc4   : > { %v932_v21 = vpop.permute.xlu0 %931  ;;  %v1034_v24 = vsel %vm1023_vm8, %v1010_v44, %v883_v30 }
  0xc5   : > { %v1091_v34 = vsel %vm1002_vm7, %v1065_v41, %v932_v21 }
  0xc7   : > { %v812_v4 = vpop.permute.xlu1 %811 }
  0xc8   : > { %v955_v33 = vpop.permute.xlu0 %954  ;;  %v986_v15 = vsel %vm971_vm5, %v3634_v53, %v812_v4 }
  0xc9   : > { %v1114_v2 = vsel %vm1023_vm8, %v1091_v34, %v955_v33 }
  0xca   : > { %1371 = vmatprep.mubr.bf16.mxu0 %v1114_v2 }
  0xcb   : > { %1372 = vmatmul.mubr.bf16.gmra.mrb[12].mxu0 %v1034_v24  ;;  %v862_v18 = vpop.permute.xlu1 %861 }
  0xcc   : > { %v911_v40 = vpop.permute.xlu0 %910  ;;  %v1012_v28 = vsel %vm1002_vm7, %v986_v15, %v862_v18 }
  0xcd   : > { %v1068_v19 = vsel %vm971_vm5, %v3719_v57, %v911_v40 }
  0xcf   : > { %v885_v3 = vpop.permute.xlu1 %884 }
  0xd0   : > { %v934_v50 = vpop.permute.xlu0 %933  ;;  %v1037_v45 = vsel %vm1023_vm8, %v1012_v28, %v885_v3 }
  0xd1   : > { %v1093_v38 = vsel %vm1002_vm7, %v1068_v19, %v934_v50 }
  0xd3   : > { %v814_v46 = vpop.permute.xlu1 %813 }
  0xd4   : > { %v957_v42 = vpop.permute.xlu0 %956  ;;  %v989_v53 = vsel %vm971_vm5, %v3684_v37, %v814_v46 }
  0xd5   : > { %v1117_v43 = vsel %vm1023_vm8, %v1093_v38, %v957_v42 }
  0xd6   : > { %1379 = vmatprep.mubr.bf16.mxu0 %v1117_v43 }
  0xd7   : > { %1380 = vmatmul.mubr.bf16.gmra.mrb[16].mxu0 %v1037_v45  ;;  %v864_v60 = vpop.permute.xlu1 %863 }
  0xd8   : > { %v913_v5 = vpop.permute.xlu0 %912  ;;  %v1014_v36 = vsel %vm1002_vm7, %v989_v53, %v864_v60 }
  0xd9   : > { %v1071_v57 = vsel %vm971_vm5, %v3812_v61, %v913_v5 }
  0xdb   : > { %v887_v1 = vpop.permute.xlu1 %886 }
  0xdc   : > { %v936_v16 = vpop.permute.xlu0 %935  ;;  %v1040_v13 = vsel %vm1023_vm8, %v1014_v36, %v887_v1 }
  0xdd   : > { %v1095_v17 = vsel %vm1002_vm7, %v1071_v57, %v936_v16  ;;  %v4061_v16 = vld [vmem:[%s4639_s3 + $0x80] sm:$0xff]  }
  0xde   : > { %3020 = vmatprep.subr.bf16.mxu0 %v4061_v16 }
  0xdf   : > { %v816_v48 = vpop.permute.xlu1 %815  ;;  %3021 = vmatpush3.bf16.msra.mxu0 %v4061_v16 }
  0xe0   : > { %v959_v49 = vpop.permute.xlu0 %958  ;;  %v992_v37 = vsel %vm971_vm5, %v3766_v22, %v816_v48 }
  0xe1   : > { %v1120_v39 = vsel %vm1023_vm8, %v1095_v17, %v959_v49  ;;  %v4076_v49 = vld [vmem:[%s4639_s3 + $0x88] sm:$0xff]  }
  0xe2   : > { %1387 = vmatprep.mubr.bf16.mxu0 %v1120_v39  ;;  %3022 = vmatprep.subr.bf16.mxu0 %v4076_v49 }
  0xe3   : > { %1388 = vmatmul.mubr.bf16.gmra.mrb[20].mxu0 %v1040_v13  ;;  %v866_v51 = vpop.permute.xlu1 %865 }
  0xe4   : > { %v915_v52 = vpop.permute.xlu0 %914  ;;  %v1016_v56 = vsel %vm1002_vm7, %v992_v37, %v866_v51  ;;  %3023 = vmatpush3.bf16.msra.mxu0 %v4076_v49 }
  0xe5   : > { %v1074_v61 = vsel %vm971_vm5, %v3872_v8, %v915_v52 }
  0xe7   : > { %v889_v58 = vpop.permute.xlu1 %888 }
  0xe8   : > { %v938_v35 = vpop.permute.xlu0 %937  ;;  %v1043_v11 = vsel %vm1023_vm8, %v1016_v56, %v889_v58 }
  0xe9   : > { %v1097_v29 = vsel %vm1002_vm7, %v1074_v61, %v938_v35 }
  0xeb   : > { %v818_v62 = vpop.permute.xlu1 %817 }
  0xec   : > { %v961_v55 = vpop.permute.xlu0 %960  ;;  %v995_v22 = vsel %vm971_vm5, %v3829_v6, %v818_v62 }
  0xed   : > { %v1123_v10 = vsel %vm1023_vm8, %v1097_v29, %v961_v55  ;;  %v4100_v29 = vld [vmem:[%s4638_s2] ss:$0 sm:$0xff] }
  0xee   : > { %1395 = vmatprep.mubr.bf16.mxu0 %v1123_v10  ;;  %v3151_v10 = vld [vmem:[%s4639_s3 + $0x40] sm:$0xff]  }
  0xef   : > { %1396 = vmatmul.mubr.bf16.gmra.mrb[24].mxu0 %v1043_v11  ;;  %v868_v59 = vpop.permute.xlu1 %867  ;;  %v3152_v11 = vld [vmem:[%s4639_s3] sm:$0xff]   ;;  %2922 = vmatprep.subr.bf16.mxu1 %v3151_v10 }
  0xf0   : > { %v917_v27 = vpop.permute.xlu0 %916  ;;  %v1018_v20 = vsel %vm1002_vm7, %v995_v22, %v868_v59  ;;  %v3153_v59 = vld [vmem:[%s4639_s3 + $0x48] sm:$0xff]   ;;  %2923 = vmatpush3.bf16.msra.mxu1 %v3152_v11 }
  0xf1   : > { %v1077_v8 = vsel %vm971_vm5, %v3906_v26, %v917_v27  ;;  %2924 = vmatprep.subr.bf16.mxu1 %v3153_v59 }
  0xf3   : > { %v891_v54 = vpop.permute.xlu1 %890 }
  0xf4   : > { %v940_v0 = vpop.permute.xlu0 %939  ;;  %v1046_v14 = vsel %vm1023_vm8, %v1018_v20, %v891_v54  ;;  %v4111_v54 = vstv %s2800_s14 }
  0xf5   : > { %v1099_v47 = vsel %vm1002_vm7, %v1077_v8, %v940_v0  ;;  %v3154_v8 = vld [vmem:[%s4639_s3 + $0x8] sm:$0xff]   ;;  %vm1572_vm9 = vcmp.ge.s32.totalorder %v4111_v54, 0  ;;  %vm1582_vm10 = vcmp.le.s32.totalorder %v4111_v54, 15 }
  0xf6   : > { %vm1592_vm11 = vmand %vm1572_vm9, %vm1582_vm10  ;;  %2925 = vmatpush3.bf16.msra.mxu1 %v3154_v8 }
  0xf7   : > { %v820_v25 = vpop.permute.xlu1 %819 }
  0xf8   : > { %v963_v7 = vpop.permute.xlu0 %962  ;;  %v998_v6 = vsel %vm971_vm5, %v3896_v23, %v820_v25 }
  0xf9   : > { %v1126_v32 = vsel %vm1023_vm8, %v1099_v47, %v963_v7  ;;  %v3155_v7 = vld [vmem:[%s4639_s3 + $0x50] sm:$0xff]  }
  0xfa   : > { %1403 = vmatprep.mubr.bf16.mxu0 %v1126_v32  ;;  %2926 = vmatprep.subr.bf16.mxu1 %v3155_v7 }
  0xfb   : > { %1404 = vmatmul.mubr.bf16.gmra.mrb[28].mxu0 %v1046_v14  ;;  %v870_v30 = vpop.permute.xlu1 %869 }
  0xfc   : > { %v919_v21 = vpop.permute.xlu0 %918  ;;  %v1020_v44 = vsel %vm1002_vm7, %v998_v6, %v870_v30 }
  0xfd   : > { %v1080_v26 = vsel %vm971_vm5, %v3929_v63, %v919_v21 }
  0xff   : > { %v893_v9 = vpop.permute.xlu1 %892 }
 0x100   : > { %v942_v41 = vpop.permute.xlu0 %941  ;;  %v1049_v24 = vsel %vm1023_vm8, %v1020_v44, %v893_v9 }
 0x101   : > { %v1101_v34 = vsel %vm1002_vm7, %v1080_v26, %v942_v41  ;;  %v1563_v41 = vadd.s32 1, %v4111_v54 }
 0x103   : > { %v822_v4 = vpop.permute.xlu1 %821  ;;  %vm1573_vm14 = vcmp.ge.s32.totalorder %v1563_v41, 0  ;;  %vm1583_vm15 = vcmp.le.s32.totalorder %v1563_v41, 15  ;;  %v3162_v41 = vld [vmem:[%s4639_s3 + $0x28] sm:$0xff]  }
 0x104   : > { %v965_v33 = vpop.permute.xlu0 %964  ;;  %v1001_v23 = vsel %vm971_vm5, %v3919_v31, %v822_v4  ;;  %v3156_v4 = vld [vmem:[%s4639_s3 + $0x10] sm:$0xff]   ;;  %vm1593_vm1 = vmand %vm1573_vm14, %vm1583_vm15 }
 0x105   : > { %v1129_v2 = vsel %vm1023_vm8, %v1101_v34, %v965_v33  ;;  %v3157_v34 = vld [vmem:[%s4639_s3 + $0x58] sm:$0xff]   ;;  %2927 = vmatpush3.bf16.msra.mxu1 %v3156_v4 }
 0x106   : > { %1411 = vmatprep.mubr.bf16.mxu0 %v1129_v2  ;;  %2928 = vmatprep.subr.bf16.mxu1 %v3157_v34 }
 0x107   : > { %1412 = vmatmul.mubr.bf16.gmra.mrb[32].mxu0 %v1049_v24  ;;  %v872_v40 = vpop.permute.xlu1 %871 }
 0x108   : > { %v921_v18 = vpop.permute.xlu0 %920  ;;  %v1022_v38 = vsel %vm1002_vm7, %v1001_v23, %v872_v40 }
 0x109   : > { %v1083_v63 = vsel %vm971_vm5, %v3866_v12, %v921_v18 }
 0x10b   : > { %v895_v50 = vpop.permute.xlu1 %894 }
 0x10c   : > { %v944_v3 = vpop.permute.xlu0 %943  ;;  %v1052_v43 = vsel %vm1023_vm8, %v1022_v38, %v895_v50  ;;  %v3158_v38 = vld [vmem:[%s4639_s3 + $0x18] sm:$0xff]  }
 0x10d   : > { %v1103_v15 = vsel %vm1002_vm7, %v1083_v63, %v944_v3  ;;  %2929 = vmatpush3.bf16.msra.mxu1 %v3158_v38 }
 0x110   : > { %v967_v19 = vpop.permute.xlu0 %966  ;;  %v4043_v46 = vpop.f32.mrb[0].mxu1 }
 0x111   : > { %v1132_v42 = vsel %vm1023_vm8, %v1103_v15, %v967_v19  ;;  %v1462_v28 = vpop.f32.mrb[1].mxu1  ;;  %v1564_v19 = vadd.s32 2, %v4111_v54 }
 0x112   : > { %1419 = vmatprep.mubr.bf16.mxu0 %v1132_v42  ;;  %v4048_v45 = vpop.f32.mrb[2].mxu1 }
 0x113   : > { %1420 = vmatmul.mubr.bf16.gmra.mrb[36].mxu0 %v1052_v43  ;;  %v1465_v31 = vpop.f32.mrb[3].mxu1  ;;  %vm1574_vm3 = vcmp.ge.s32.totalorder %v1564_v19, 0  ;;  %vm1584_vm4 = vcmp.le.s32.totalorder %v1564_v19, 15 }
 0x114   : > { %vm1594_vm9 = vmand %vm1574_vm3, %vm1584_vm4 }
 0x11b   : > { %v4050_v60 = vpop.f32.mrb[4].mxu1 }
 0x11c   : > { %v4052_v12 = vpop.f32.mrb[5].mxu1 }
 0x11d   : > { %v4054_v5 = vpop.f32.mrb[6].mxu1 }
 0x11e   : > { %v4056_v1 = vpop.f32.mrb[7].mxu1 }
 0x127   : > { %v4063_v53 = vpop.f32.mrb[8].mxu1 }
 0x128   : > { %v4065_v57 = vpop.f32.mrb[9].mxu1 }
 0x129   : > { %v4068_v48 = vpop.f32.mrb[10].mxu1 }
 0x12a   : > { %v4071_v17 = vpop.f32.mrb[11].mxu1 }
 0x12f   : > { %v4080_v36 = vpop.f32.mrb[12].mxu1 }
 0x130   : > { %v4082_v39 = vpop.f32.mrb[13].mxu1 }
 0x131   : > { %v4084_v13 = vpop.f32.mrb[14].mxu1 }
 0x132   : > { %v4086_v51 = vpop.f32.mrb[15].mxu1 }
 0x140   : > { %v4088_v52 = vpop.f32.mrb[16].mxu1 }
 0x141   : > { %v4090_v58 = vpop.f32.mrb[17].mxu1 }
 0x142   : > { %v4092_v35 = vpop.f32.mrb[18].mxu1 }
 0x143   : > { %v4094_v37 = vpop.f32.mrb[19].mxu1 }
 0x181   : > { %v2850_v61 = vpop.f32.mrb[0].mxu0 }
 0x182   : > { %v2851_v62 = vpop.f32.mrb[1].mxu0 }
 0x183   : > { %v2852_v55 = vadd.f32 %v2851_v62, %v2850_v61  ;;  %v2853_v56 = vpop.f32.mrb[2].mxu0 }
 0x184   : > { %v2854_v27 = vpop.f32.mrb[3].mxu0 }
 0x185   : > { %v2855_v0 = vadd.f32 %v2854_v27, %v2853_v56  ;;  %v1350_v22 = vadd.f32 %v2852_v55, %v4100_v29  ;;  %v3160_v27 = vld [vmem:[%s4639_s3 + $0x20] sm:$0xff]  }
 0x187   : > { %v1463_v25 = vadd.f32 %v1462_v28, %v1350_v22  ;;  %v1353_v47 = vadd.f32 %v2855_v0, %v4100_v29  ;;  %v3161_v0 = vld [vmem:[%s4639_s3 + $0x68] sm:$0xff]  }
 0x189   : > { %v1541_v20 = vmax.f32 %v1463_v25, 0.0  ;;  %v1466_v32 = vadd.f32 %v1465_v31, %v1353_v47  ;;  %v2856_v14 = vpop.f32.mrb[4].mxu0 }
 0x18a   : > { %v2857_v30 = vpop.f32.mrb[5].mxu0 }
 0x18b   : > { %v1542_v21 = vmax.f32 %v1466_v32, 0.0  ;;  %v2858_v9 = vadd.f32 %v2857_v30, %v2856_v14  ;;  %v2859_v6 = vpop.f32.mrb[6].mxu0  ;;  %v1622_v33 = vsel %vm1592_vm11, %v1541_v20, 0.0 }
 0x18c   : > { %v2860_v26 = vpop.f32.mrb[7].mxu0 }
 0x18d   : > { %v1623_v44 = vsel %vm1592_vm11, %v1542_v21, 0.0  ;;  %v1358_v2 = vadd.f32 %v2858_v9, %v4100_v29  ;;  %v2861_v24 = vadd.f32 %v2860_v26, %v2859_v6 }
 0x18e   : > { %v1642_v18 = vpack.c.bf16 %v1623_v44, %v1622_v33 }
 0x18f   : > { %v1471_v40 = vadd.f32 %v4043_v46, %v1358_v2  ;;  %v1361_v3 = vadd.f32 %v2861_v24, %v4100_v29  ;;  %v3159_v46 = vld [vmem:[%s4639_s3 + $0x60] sm:$0xff]  }
 0x190   : > { %v1653_v23 = vshrl.u32 %v1642_v18, 16  ;;  %v1656_v28 = vshll.u32 %v1642_v18, 16  ;;  %2930 = vmatprep.subr.bf16.mxu1 %v3159_v46  ;;  %v3163_v18 = vld [vmem:[%s4639_s3 + $0x70] sm:$0xff]  }
 0x191   : > { %v1543_v50 = vmax.f32 %v1471_v40, 0.0  ;;  %v1474_v15 = vadd.f32 %v4048_v45, %v1361_v3  ;;  %2931 = vmatpush3.bf16.msra.mxu1 %v3160_v27 }
 0x192   : > { %v1655_v42 = vrot.slane %v1653_v23, 7  ;;  %v2862_v43 = vpop.f32.mrb[8].mxu0  ;;  %2932 = vmatprep.subr.bf16.mxu1 %v3161_v0 }
 0x193   : > { %v1544_v31 = vmax.f32 %v1474_v15, 0.0  ;;  %v2863_v61 = vpop.f32.mrb[9].mxu0  ;;  %v1624_v10 = vsel %vm1593_vm1, %v1543_v50, 0.0  ;;  %v3164_v50 = vld [vmem:[%s4639_s3 + $0x30] sm:$0xff]  }
 0x194   : > { %v1658_v62 = vor.u32 %v1656_v28, %v1655_v42  ;;  %v2864_v55 = vadd.f32 %v2863_v61, %v2862_v43  ;;  %v2865_v45 = vpop.f32.mrb[10].mxu0  ;;  %v1755_v56 = vsel %vm4133_vm0, %v1655_v42, 0 }
 0x195   : > { %v1625_v11 = vsel %vm1593_vm1, %v1544_v31, 0.0  ;;  %v2866_v59 = vpop.f32.mrb[11].mxu0  ;;  %v1880_v20 = vrot.slane %v1755_v56, 1  ;;  %v1774_v14 = vshll.u32 %v1755_v56, 16  ;;  %2933 = vmatpush3.bf16.msra.mxu1 %v3162_v41 }
 0x196   : > { %v4155_v22 = vsel %vm4133_vm0, 0, %v1658_v62  ;;  %v1643_v8 = vpack.c.bf16 %v1625_v11, %v1624_v10  ;;  %v2867_v25 = vadd.f32 %v2866_v59, %v2865_v45  ;;  %v1366_v47 = vadd.f32 %v2864_v55, %v4100_v29  ;;  %2934 = vmatprep.subr.bf16.mxu1 %v3163_v18  ;;  %v3165_v62 = vld [vmem:[%s4639_s3 + $0x78] sm:$0xff]  }
 0x197   : > { %v1879_v7 = vrot.slane %v4155_v22, 1  ;;  %v1769_v32 = vshll.u32 %v4155_v22, 16  ;;  %v1767_v26 = vshrl.u32 %v4155_v22, 16  ;;  %v1776_v24 = vrot.slane %v1774_v14, 1  ;;  %v3166_v10 = vld [vmem:[%s4639_s3 + $0x38] sm:$0xff]  }
 0x198   : > { %v1660_v30 = vshrl.u32 %v1643_v8, 16  ;;  %v1479_v21 = vadd.f32 %v4052_v12, %v1366_v47  ;;  %v1369_v9 = vadd.f32 %v2867_v25, %v4100_v29  ;;  %v1663_v44 = vshll.u32 %v1643_v8, 16 }
 0x199   : > { %v1881_v6 = vsel %vm1878_vm2, %v1879_v7, %v1880_v20  ;;  %v1771_v4 = vrot.slane %v1769_v32, 1  ;;  %2935 = vmatpush3.bf16.msra.mxu1 %v3164_v50  ;;  %v1565_v45 = vadd.s32 3, %v4111_v54 }
 0x19a   : > { %v1545_v34 = vmax.f32 %v1479_v21, 0.0  ;;  %v1482_v33 = vadd.f32 %v4056_v1, %v1369_v9  ;;  %1953 = vrot.lane.b32.xlu1 %v1881_v6, %s3263_s9  ;;  %v1662_v12 = vrot.slane %v1660_v30, 7  ;;  %2936 = vmatprep.subr.bf16.mxu1 %v3165_v62 }
 0x19b   : > { %v1772_v2 = vor.u32 %v1771_v4, %v1767_v26  ;;  %vm1575_vm10 = vcmp.ge.s32.totalorder %v1565_v45, 0  ;;  %vm1585_vm11 = vcmp.le.s32.totalorder %v1565_v45, 15 }
 0x19c   : > { %v1546_v40 = vmax.f32 %v1482_v33, 0.0  ;;  %v1665_v3 = vor.u32 %v1663_v44, %v1662_v12  ;;  %v1756_v23 = vsel %vm4133_vm0, %v1662_v12, 0  ;;  %v1626_v15 = vsel %vm1594_vm9, %v1545_v34, 0.0  ;;  %vm1595_vm12 = vmand %vm1575_vm10, %vm1585_vm11 }
 0x19d   : > { %v1777_v1 = vsel %vm1765_vm6, %v1772_v2, %v1776_v24  ;;  %v1883_v31 = vrot.slane %v1756_v23, 1  ;;  %v1786_v32 = vshll.u32 %v1756_v23, 16  ;;  %2937 = vmatpush3.bf16.msra.mxu1 %v3166_v10 }
 0x19e   : > { %v1627_v19 = vsel %vm1594_vm9, %v1546_v40, 0.0  ;;  %v2868_v38 = vpop.f32.mrb[12].mxu0  ;;  %1937 = vrot.lane.b32.xlu1 %v1777_v1, %s3265_s30  ;;  %v4182_v46 = vsel %vm4133_vm0, 0, %v1665_v3  ;;  %3040 = vmatprep.subr.bf16.mxu1 %v4061_v16 }
 0x19f   : > { %v1644_v42 = vpack.c.bf16 %v1627_v19, %v1626_v15  ;;  %v2869_v28 = vpop.f32.mrb[13].mxu0  ;;  %v1882_v43 = vrot.slane %v4182_v46, 1  ;;  %v1781_v61 = vshll.u32 %v4182_v46, 16  ;;  %v1779_v20 = vshrl.u32 %v4182_v46, 16 }
 0x1a0   : > { %v2870_v55 = vadd.f32 %v2869_v28, %v2868_v38  ;;  %v2871_v56 = vpop.f32.mrb[14].mxu0  ;;  %v1788_v4 = vrot.slane %v1786_v32, 1 }
 0x1a1   : > { %v1667_v11 = vshrl.u32 %v1644_v42, 16  ;;  %v2872_v59 = vpop.f32.mrb[15].mxu0  ;;  %v1884_v27 = vsel %vm1878_vm2, %v1882_v43, %v1883_v31  ;;  %v1783_v0 = vrot.slane %v1781_v61, 1  ;;  %v1670_v7 = vshll.u32 %v1644_v42, 16 }
 0x1a2   : > { %v1374_v8 = vadd.f32 %v2870_v55, %v4100_v29  ;;  %v2873_v25 = vadd.f32 %v2872_v59, %v2871_v56  ;;  %1969 = vrot.lane.b32.xlu1 %v4182_v46, %s4657_s29  ;;  %1985 = vrot.lane.b32.xlu0 %v1884_v27, %s3265_s30  ;;  %v1566_v42 = vadd.s32 4, %v4111_v54 }
 0x1a3   : > { %v1669_v47 = vrot.slane %v1667_v11, 7  ;;  %v1784_v41 = vor.u32 %v1783_v0, %v1779_v20 }
 0x1a4   : > { %v1487_v14 = vadd.f32 %v4050_v60, %v1374_v8  ;;  %v1377_v30 = vadd.f32 %v2873_v25, %v4100_v29  ;;  %vm1576_vm13 = vcmp.ge.s32.totalorder %v1566_v42, 0  ;;  %vm1586_vm14 = vcmp.le.s32.totalorder %v1566_v42, 15 }
 0x1a5   : > { %v1672_v21 = vor.u32 %v1670_v7, %v1669_v47  ;;  %v1757_v9 = vsel %vm4133_vm0, %v1669_v47, 0  ;;  %v4214_v44 = vsel %vm1765_vm6, %v1784_v41, %v1788_v4  ;;  %vm1596_vm15 = vmand %vm1576_vm13, %vm1586_vm14 }
 0x1a6   : > { %v1547_v6 = vmax.f32 %v1487_v14, 0.0  ;;  %v1490_v26 = vadd.f32 %v4054_v5, %v1377_v30  ;;  %1955 = vrot.lane.b32.xlu1 %v1884_v27, %s3263_s9  ;;  %v1886_v12 = vrot.slane %v1757_v9, 1  ;;  %v1798_v2 = vshll.u32 %v1757_v9, 16 }
 0x1a7   : > { %v4208_v60 = vsel %vm4133_vm0, 0, %v1672_v21 }
 0x1a8   : > { %v1548_v34 = vmax.f32 %v1490_v26, 0.0  ;;  %2001 = vrot.lane.b32.xlu0 %v4208_v60, %s3263_s9  ;;  %v1885_v33 = vrot.slane %v4208_v60, 1  ;;  %v1793_v5 = vshll.u32 %v4208_v60, 16  ;;  %v1628_v24 = vsel %vm1595_vm12, %v1547_v6, 0.0 }
 0x1a9   : > { %v1791_v50 = vshrl.u32 %v4208_v60, 16  ;;  %v1800_v61 = vrot.slane %v1798_v2, 1 }
 0x1aa   : > { %v1629_v18 = vsel %vm1595_vm12, %v1548_v34, 0.0  ;;  %v2874_v40 = vpop.f32.mrb[16].mxu0  ;;  %1939 = vrot.lane.b32.xlu1 %v4214_v44, %s3265_s30  ;;  %v1887_v3 = vsel %vm1878_vm2, %v1885_v33, %v1886_v12  ;;  %v1795_v15 = vrot.slane %v1793_v5, 1  ;;  %v1567_v33 = vadd.s32 5, %v4111_v54 }
 0x1ab   : > { %v1645_v23 = vpack.c.bf16 %v1629_v18, %v1628_v24  ;;  %v2875_v1 = vpop.f32.mrb[17].mxu0  ;;  %3024 = vmatprep.mubr.msk.bf16.mxu0 %vm971_vm5, %v1887_v3 }
 0x1ac   : > { %v2876_v19 = vadd.f32 %v2875_v1, %v2874_v40  ;;  %1987 = vrot.lane.b32.xlu0 %v1887_v3, %s3265_s30  ;;  %v2877_v38 = vpop.f32.mrb[18].mxu0  ;;  %v1796_v31 = vor.u32 %v1795_v15, %v1791_v50  ;;  %vm1577_vm1 = vcmp.ge.s32.totalorder %v1567_v33, 0  ;;  %vm1587_vm3 = vcmp.le.s32.totalorder %v1567_v33, 15 }
 0x1ad   : > { %v1674_v28 = vshrl.u32 %v1645_v23, 16  ;;  %v2878_v43 = vpop.f32.mrb[19].mxu0  ;;  %v1677_v56 = vshll.u32 %v1645_v23, 16  ;;  %vm1597_vm4 = vmand %vm1577_vm1, %vm1587_vm3 }
 0x1ae   : > { %v2879_v62 = vadd.f32 %v2878_v43, %v2877_v38  ;;  %v1382_v55 = vadd.f32 %v2876_v19, %v4100_v29  ;;  %1971 = vrot.lane.b32.xlu1 %v4208_v60, %s4657_s29  ;;  %v4228_v10 = vsel %vm1765_vm6, %v1796_v31, %v1800_v61 }
 0x1af   : > { %v1676_v45 = vrot.slane %v1674_v28, 7 }
 0x1b0   : > { %v1495_v11 = vadd.f32 %v4065_v57, %v1382_v55  ;;  %2017 = vrot.lane.b32.xlu0 %v4228_v10, %s4657_s29  ;;  %v1385_v59 = vadd.f32 %v2879_v62, %v4100_v29 }
 0x1b1   : > { %v1758_v27 = vsel %vm4133_vm0, %v1676_v45, 0  ;;  %v1679_v0 = vor.u32 %v1677_v56, %v1676_v45 }
 0x1b2   : > { %v1549_v8 = vmax.f32 %v1495_v11, 0.0  ;;  %v1498_v25 = vadd.f32 %v4071_v17, %v1385_v59  ;;  %1957 = vrot.lane.b32.xlu1 %v1887_v3, %s3263_s9  ;;  %v1889_v20 = vrot.slane %v1758_v27, 1  ;;  %v1810_v14 = vshll.u32 %v1758_v27, 16 }
 0x1b3   : > { %v4240_v57 = vsel %vm4133_vm0, 0, %v1679_v0 }
 0x1b4   : > { %v1550_v47 = vmax.f32 %v1498_v25, 0.0  ;;  %2003 = vrot.lane.b32.xlu0 %v4240_v57, %s3263_s9  ;;  %v1888_v7 = vrot.slane %v4240_v57, 1  ;;  %v1805_v32 = vshll.u32 %v4240_v57, 16  ;;  %v1630_v30 = vsel %vm1596_vm15, %v1549_v8, 0.0 }
 0x1b5   : > { %v1803_v26 = vshrl.u32 %v4240_v57, 16  ;;  %v1812_v18 = vrot.slane %v1810_v14, 1 }
 0x1b6   : > { %v1631_v21 = vsel %vm1596_vm15, %v1550_v47, 0.0  ;;  %v2880_v17 = vpop.f32.mrb[20].mxu0  ;;  %1941 = vrot.lane.b32.xlu1 %v4228_v10, %s3265_s30  ;;  %v1890_v9 = vsel %vm1878_vm2, %v1888_v7, %v1889_v20  ;;  %v1807_v4 = vrot.slane %v1805_v32, 1  ;;  %v1568_v20 = vadd.s32 6, %v4111_v54 }
 0x1b7   : > { %v1646_v41 = vpack.c.bf16 %v1631_v21, %v1630_v30  ;;  %v2881_v6 = vpop.f32.mrb[21].mxu0  ;;  %3025 = vmatmul.mubr.msk.bf16.vlgmr.msra.gmra.mrb[40].mxu0 %vm971_vm5, %v1890_v9 }
 0x1b8   : > { %v2882_v34 = vadd.f32 %v2881_v6, %v2880_v17  ;;  %1989 = vrot.lane.b32.xlu0 %v1890_v9, %s3265_s30  ;;  %v2883_v12 = vpop.f32.mrb[22].mxu0  ;;  %v1808_v24 = vor.u32 %v1807_v4, %v1803_v26  ;;  %vm1578_vm9 = vcmp.ge.s32.totalorder %v1568_v20, 0  ;;  %vm1588_vm10 = vcmp.le.s32.totalorder %v1568_v20, 15 }
 0x1b9   : > { %v1681_v5 = vshrl.u32 %v1646_v41, 16  ;;  %v2884_v2 = vpop.f32.mrb[23].mxu0  ;;  %v1684_v1 = vshll.u32 %v1646_v41, 16  ;;  %vm1598_vm11 = vmand %vm1578_vm9, %vm1588_vm10 }
 0x1ba   : > { %v1390_v40 = vadd.f32 %v2882_v34, %v4100_v29  ;;  %v2885_v3 = vadd.f32 %v2884_v2, %v2883_v12  ;;  %1973 = vrot.lane.b32.xlu1 %v4240_v57, %s4657_s29  ;;  %v4257_v50 = vsel %vm1765_vm6, %v1808_v24, %v1812_v18 }
 0x1bb   : > { %v1683_v23 = vrot.slane %v1681_v5, 7 }
 0x1bc   : > { %v1503_v15 = vadd.f32 %v4063_v53, %v1390_v40  ;;  %v1393_v19 = vadd.f32 %v2885_v3, %v4100_v29  ;;  %2019 = vrot.lane.b32.xlu0 %v4257_v50, %s4657_s29 }
 0x1bd   : > { %v1686_v38 = vor.u32 %v1684_v1, %v1683_v23  ;;  %v1759_v42 = vsel %vm4133_vm0, %v1683_v23, 0 }
 0x1be   : > { %v1551_v28 = vmax.f32 %v1503_v15, 0.0  ;;  %v1506_v43 = vadd.f32 %v4068_v48, %v1393_v19  ;;  %1959 = vrot.lane.b32.xlu1 %v1890_v9, %s3263_s9  ;;  %v1892_v62 = vrot.slane %v1759_v42, 1  ;;  %v1822_v45 = vshll.u32 %v1759_v42, 16 }
 0x1bf   : > { %v4269_v53 = vsel %vm4133_vm0, 0, %v1686_v38 }
 0x1c0   : > { %v1552_v31 = vmax.f32 %v1506_v43, 0.0  ;;  %2005 = vrot.lane.b32.xlu0 %v4269_v53, %s3263_s9  ;;  %v1891_v61 = vrot.slane %v4269_v53, 1  ;;  %v1817_v55 = vshll.u32 %v4269_v53, 16  ;;  %v1632_v56 = vsel %vm1597_vm4, %v1551_v28, 0.0 }
 0x1c1   : > { %v1815_v8 = vshrl.u32 %v4269_v53, 16  ;;  %v1824_v21 = vrot.slane %v1822_v45, 1 }
 0x1c2   : > { %v1633_v11 = vsel %vm1597_vm4, %v1552_v31, 0.0  ;;  %v2886_v48 = vpop.f32.mrb[24].mxu0  ;;  %1943 = vrot.lane.b32.xlu1 %v4257_v50, %s3265_s30  ;;  %v1893_v59 = vsel %vm1878_vm2, %v1891_v61, %v1892_v62  ;;  %v1819_v25 = vrot.slane %v1817_v55, 1  ;;  %v1569_v61 = vadd.s32 7, %v4111_v54 }
 0x1c3   : > { %v1647_v27 = vpack.c.bf16 %v1633_v11, %v1632_v56  ;;  %v2887_v0 = vpop.f32.mrb[25].mxu0  ;;  %3028 = vmatprep.mubr.msk.bf16.mxu0 %vm971_vm5, %v1893_v59 }
 0x1c4   : > { %v2888_v47 = vadd.f32 %v2887_v0, %v2886_v48  ;;  %1991 = vrot.lane.b32.xlu0 %v1893_v59, %s3265_s30  ;;  %v2889_v7 = vpop.f32.mrb[26].mxu0  ;;  %v1820_v30 = vor.u32 %v1819_v25, %v1815_v8  ;;  %vm1579_vm12 = vcmp.ge.s32.totalorder %v1569_v61, 0  ;;  %vm1589_vm13 = vcmp.le.s32.totalorder %v1569_v61, 15 }
 0x1c5   : > { %v1688_v32 = vshrl.u32 %v1647_v27, 16  ;;  %v2890_v14 = vpop.f32.mrb[27].mxu0  ;;  %v1691_v6 = vshll.u32 %v1647_v27, 16  ;;  %vm1599_vm14 = vmand %vm1579_vm12, %vm1589_vm13 }
 0x1c6   : > { %v2891_v17 = vadd.f32 %v2890_v14, %v2889_v7  ;;  %v1398_v9 = vadd.f32 %v2888_v47, %v4100_v29  ;;  %1975 = vrot.lane.b32.xlu1 %v4269_v53, %s4657_s29  ;;  %v4286_v26 = vsel %vm1765_vm6, %v1820_v30, %v1824_v21 }
 0x1c7   : > { %v1690_v41 = vrot.slane %v1688_v32, 7 }
 0x1c8   : > { %v1511_v4 = vadd.f32 %v4082_v39, %v1398_v9  ;;  %2021 = vrot.lane.b32.xlu0 %v4286_v26, %s4657_s29  ;;  %v1401_v34 = vadd.f32 %v2891_v17, %v4100_v29 }
 0x1c9   : > { %v1693_v33 = vor.u32 %v1691_v6, %v1690_v41  ;;  %v1760_v12 = vsel %vm4133_vm0, %v1690_v41, 0 }
 0x1ca   : > { %v1553_v5 = vmax.f32 %v1511_v4, 0.0  ;;  %v1514_v2 = vadd.f32 %v4086_v51, %v1401_v34  ;;  %1961 = vrot.lane.b32.xlu1 %v1893_v59, %s3263_s9  ;;  %v1895_v40 = vrot.slane %v1760_v12, 1  ;;  %v1834_v23 = vshll.u32 %v1760_v12, 16 }
 0x1cb   : > { %v4298_v39 = vsel %vm4133_vm0, 0, %v1693_v33 }
 0x1cc   : > { %v1554_v24 = vmax.f32 %v1514_v2, 0.0  ;;  %2007 = vrot.lane.b32.xlu0 %v4298_v39, %s3263_s9  ;;  %v1894_v18 = vrot.slane %v4298_v39, 1  ;;  %v1829_v3 = vshll.u32 %v4298_v39, 16  ;;  %v1634_v1 = vsel %vm1598_vm11, %v1553_v5, 0.0 }
 0x1cd   : > { %v1827_v28 = vshrl.u32 %v4298_v39, 16  ;;  %v1836_v11 = vrot.slane %v1834_v23, 1 }
 0x1ce   : > { %v1635_v15 = vsel %vm1598_vm11, %v1554_v24, 0.0  ;;  %v2892_v51 = vpop.f32.mrb[28].mxu0  ;;  %1945 = vrot.lane.b32.xlu1 %v4286_v26, %s3265_s30  ;;  %v1896_v19 = vsel %vm1878_vm2, %v1894_v18, %v1895_v40  ;;  %v1831_v43 = vrot.slane %v1829_v3, 1  ;;  %v1570_v40 = vadd.s32 8, %v4111_v54 }
 0x1cf   : > { %v1648_v38 = vpack.c.bf16 %v1635_v15, %v1634_v1  ;;  %v2893_v42 = vpop.f32.mrb[29].mxu0  ;;  %3029 = vmatmul.mubr.msk.bf16.gmra.mrb[44].mxu0 %vm971_vm5, %v1896_v19 }
 0x1d0   : > { %v2894_v31 = vadd.f32 %v2893_v42, %v2892_v51  ;;  %1993 = vrot.lane.b32.xlu0 %v1896_v19, %s3265_s30  ;;  %v2895_v62 = vpop.f32.mrb[30].mxu0  ;;  %v1832_v56 = vor.u32 %v1831_v43, %v1827_v28  ;;  %vm1580_vm15 = vcmp.ge.s32.totalorder %v1570_v40, 0  ;;  %vm1590_vm1 = vcmp.le.s32.totalorder %v1570_v40, 15 }
 0x1d1   : > { %v1695_v55 = vshrl.u32 %v1648_v38, 16  ;;  %v2896_v45 = vpop.f32.mrb[31].mxu0  ;;  %v1698_v0 = vshll.u32 %v1648_v38, 16  ;;  %vm1600_vm3 = vmand %vm1580_vm15, %vm1590_vm1 }
 0x1d2   : > { %v1406_v48 = vadd.f32 %v2894_v31, %v4100_v29  ;;  %v2897_v59 = vadd.f32 %v2896_v45, %v2895_v62  ;;  %1977 = vrot.lane.b32.xlu1 %v4298_v39, %s4657_s29  ;;  %v4315_v8 = vsel %vm1765_vm6, %v1832_v56, %v1836_v11 }
 0x1d3   : > { %v1697_v27 = vrot.slane %v1695_v55, 7 }
 0x1d4   : > { %v1519_v25 = vadd.f32 %v4080_v36, %v1406_v48  ;;  %v1409_v47 = vadd.f32 %v2897_v59, %v4100_v29  ;;  %2023 = vrot.lane.b32.xlu0 %v4315_v8, %s4657_s29 }
 0x1d5   : > { %v1700_v7 = vor.u32 %v1698_v0, %v1697_v27  ;;  %v1761_v20 = vsel %vm4133_vm0, %v1697_v27, 0 }
 0x1d6   : > { %v1555_v32 = vmax.f32 %v1519_v25, 0.0  ;;  %v1522_v14 = vadd.f32 %v4084_v13, %v1409_v47  ;;  %1963 = vrot.lane.b32.xlu1 %v1896_v19, %s3263_s9  ;;  %v1898_v17 = vrot.slane %v1761_v20, 1  ;;  %v1846_v41 = vshll.u32 %v1761_v20, 16 }
 0x1d7   : > { %v4327_v36 = vsel %vm4133_vm0, 0, %v1700_v7 }
 0x1d8   : > { %v1556_v30 = vmax.f32 %v1522_v14, 0.0  ;;  %2009 = vrot.lane.b32.xlu0 %v4327_v36, %s3263_s9  ;;  %v1897_v21 = vrot.slane %v4327_v36, 1  ;;  %v1841_v9 = vshll.u32 %v4327_v36, 16  ;;  %v1636_v6 = vsel %vm1599_vm14, %v1555_v32, 0.0 }
 0x1d9   : > { %v1839_v5 = vshrl.u32 %v4327_v36, 16  ;;  %v1848_v15 = vrot.slane %v1846_v41, 1 }
 0x1da   : > { %v1637_v4 = vsel %vm1599_vm14, %v1556_v30, 0.0  ;;  %v2898_v13 = vpop.f32.mrb[32].mxu0  ;;  %1947 = vrot.lane.b32.xlu1 %v4315_v8, %s3265_s30  ;;  %v4336_v34 = vsel %vm1878_vm2, %v1897_v21, %v1898_v17  ;;  %v1843_v2 = vrot.slane %v1841_v9, 1  ;;  %v1571_v21 = vadd.s32 9, %v4111_v54 }
 0x1db   : > { %v1649_v33 = vpack.c.bf16 %v1637_v4, %v1636_v6  ;;  %v2899_v12 = vpop.f32.mrb[33].mxu0 }
 0x1dc   : > { %v2900_v24 = vadd.f32 %v2899_v12, %v2898_v13  ;;  %1995 = vrot.lane.b32.xlu0 %v4336_v34, %s3265_s30  ;;  %v2901_v18 = vpop.f32.mrb[34].mxu0  ;;  %v1844_v1 = vor.u32 %v1843_v2, %v1839_v5  ;;  %vm1581_vm4 = vcmp.ge.s32.totalorder %v1571_v21, 0  ;;  %vm1591_vm9 = vcmp.le.s32.totalorder %v1571_v21, 15 }
 0x1dd   : > { %v1702_v3 = vshrl.u32 %v1649_v33, 16  ;;  %v2902_v23 = vpop.f32.mrb[35].mxu0  ;;  %v1705_v42 = vshll.u32 %v1649_v33, 16  ;;  %vm1601_vm10 = vmand %vm1581_vm4, %vm1591_vm9 }
 0x1de   : > { %v2903_v51 = vadd.f32 %v2902_v23, %v2901_v18  ;;  %v1414_v19 = vadd.f32 %v2900_v24, %v4100_v29  ;;  %1979 = vrot.lane.b32.xlu1 %v4327_v36, %s4657_s29  ;;  %v4346_v28 = vsel %vm1765_vm6, %v1844_v1, %v1848_v15 }
 0x1df   : > { %v1704_v38 = vrot.slane %v1702_v3, 7 }
 0x1e0   : > { %v1527_v43 = vadd.f32 %v4090_v58, %v1414_v19  ;;  %2025 = vrot.lane.b32.xlu0 %v4346_v28, %s4657_s29  ;;  %v1417_v31 = vadd.f32 %v2903_v51, %v4100_v29 }
 0x1e1   : > { %v1707_v61 = vor.u32 %v1705_v42, %v1704_v38  ;;  %v1762_v62 = vsel %vm4133_vm0, %v1704_v38, 0 }
 0x1e2   : > { %v1557_v55 = vmax.f32 %v1527_v43, 0.0  ;;  %v1530_v45 = vadd.f32 %v4094_v37, %v1417_v31  ;;  %1965 = vrot.lane.b32.xlu1 %v4336_v34, %s3263_s9  ;;  %v1901_v48 = vrot.slane %v1762_v62, 1  ;;  %v1858_v27 = vshll.u32 %v1762_v62, 16 }
 0x1e3   : > { %v4359_v58 = vsel %vm4133_vm0, 0, %v1707_v61 }
 0x1e4   : > { %v1558_v56 = vmax.f32 %v1530_v45, 0.0  ;;  %2011 = vrot.lane.b32.xlu0 %v4359_v58, %s3263_s9  ;;  %v1900_v11 = vrot.slane %v4359_v58, 1  ;;  %v1853_v59 = vshll.u32 %v4359_v58, 16  ;;  %v1638_v0 = vsel %vm1600_vm3, %v1557_v55, 0.0 }
 0x1e5   : > { %v1851_v32 = vshrl.u32 %v4359_v58, 16  ;;  %v1860_v4 = vrot.slane %v1858_v27, 1 }
 0x1e6   : > { %v1639_v37 = vsel %vm1600_vm3, %v1558_v56, 0.0  ;;  %v2904_v25 = vpop.f32.mrb[36].mxu0  ;;  %1949 = vrot.lane.b32.xlu1 %v4346_v28, %s3265_s30  ;;  %v4368_v47 = vsel %vm1878_vm2, %v1900_v11, %v1901_v48  ;;  %v1855_v14 = vrot.slane %v1853_v59, 1 }
 0x1e7   : > { %v1650_v7 = vpack.c.bf16 %v1639_v37, %v1638_v0  ;;  %v2905_v20 = vpop.f32.mrb[37].mxu0 }
 0x1e8   : > { %v2906_v30 = vadd.f32 %v2905_v20, %v2904_v25  ;;  %1997 = vrot.lane.b32.xlu0 %v4368_v47, %s3265_s30  ;;  %v2907_v17 = vpop.f32.mrb[38].mxu0  ;;  %v1856_v6 = vor.u32 %v1855_v14, %v1851_v32 }
 0x1e9   : > { %v1709_v9 = vshrl.u32 %v1650_v7, 16  ;;  %v2908_v41 = vpop.f32.mrb[39].mxu0  ;;  %v1712_v5 = vshll.u32 %v1650_v7, 16 }
 0x1ea   : > { %v1422_v13 = vadd.f32 %v2906_v30, %v4100_v29  ;;  %v2909_v33 = vadd.f32 %v2908_v41, %v2907_v17  ;;  %1981 = vrot.lane.b32.xlu1 %v4359_v58, %s4657_s29  ;;  %v4378_v2 = vsel %vm1765_vm6, %v1856_v6, %v1860_v4 }
 0x1eb   : > { %v1711_v12 = vrot.slane %v1709_v9, 7 }
 0x1ec   : > { %v1535_v54 = vadd.f32 %v4088_v52, %v1422_v13  ;;  %v1425_v24 = vadd.f32 %v2909_v33, %v4100_v29  ;;  %2027 = vrot.lane.b32.xlu0 %v4378_v2, %s4657_s29 }
 0x1ed   : > { %v1763_v18 = vsel %vm4133_vm0, %v1711_v12, 0  ;;  %v1714_v40 = vor.u32 %v1712_v5, %v1711_v12 }
 0x1ee   : > { %v1559_v3 = vmax.f32 %v1535_v54, 0.0  ;;  %v1538_v23 = vadd.f32 %v4092_v35, %v1425_v24  ;;  %1967 = vrot.lane.b32.xlu1 %v4368_v47, %s3263_s9  ;;  %v1918_v15 = vrot.slane %v1763_v18, 1  ;;  %v1911_v19 = vshll.u32 %v1763_v18, 16 }
 0x1ef   : > { %v1753_v52 = vsel %vm4133_vm0, 0, %v1714_v40 }
 0x1f0   : > { %v1560_v1 = vmax.f32 %v1538_v23, 0.0  ;;  %2013 = vrot.lane.b32.xlu0 %v1753_v52, %s3263_s9  ;;  %v1917_v29 = vrot.slane %v1753_v52, 1  ;;  %v1906_v51 = vshll.u32 %v1753_v52, 16  ;;  %v1640_v38 = vsel %vm1601_vm10, %v1559_v3, 0.0 }
 0x1f1   : > { %v1904_v31 = vshrl.u32 %v1753_v52, 16  ;;  %v1913_v55 = vrot.slane %v1911_v19, 1 }
 0x1f2   : > { %v1641_v42 = vsel %vm1601_vm10, %v1560_v1, 0.0  ;;  %1951 = vrot.lane.b32.xlu1 %v4378_v2, %s3265_s30  ;;  %v4395_v35 = vsel %vm1878_vm2, %v1917_v29, %v1918_v15  ;;  %v1908_v61 = vrot.slane %v1906_v51, 1 }
 0x1f3   : > { %v1651_v43 = vpack.c.bf16 %v1641_v42, %v1640_v38 }
 0x1f4   : > { %1999 = vrot.lane.b32.xlu0 %v4395_v35, %s3265_s30  ;;  %v1909_v62 = vor.u32 %v1908_v61, %v1904_v31  ;;  %s2718_s30 = sshll.u32 %s3375_s16, 5  ;;  %s270_s16 = sand.u32 1, %s3237_s22  }
 0x1f5   : > { %v1716_v45 = vshrl.u32 %v1651_v43, 16  ;;  %v1719_v48 = vshll.u32 %v1651_v43, 16  ;;  %s2715_s20 = sshll.u32 %s270_s16, 3 }
 0x1f6   : > { %1983 = vrot.lane.b32.xlu1 %v1753_v52, %s4657_s29  ;;  %v4401_v56 = vsel %vm1765_vm6, %v1909_v62, %v1913_v55 }
 0x1f7   : > { %v1718_v11 = vrot.slane %v1716_v45, 7 }
 0x1f8   : > { %2029 = vrot.lane.b32.xlu0 %v4401_v56, %s4657_s29 }
 0x1f9   : > { %v1721_v59 = vor.u32 %v1719_v48, %v1718_v11  ;;  %v1764_v27 = vsel %vm4133_vm0, %v1718_v11, 0 }
 0x1fa   : > { %v1928_v7 = vshll.u32 %v1764_v27, 16  ;;  %v1935_v20 = vrot.slane %v1764_v27, 1 }
 0x1fb   : > { %v1754_v0 = vsel %vm4133_vm0, 0, %v1721_v59 }
 0x1fc   : > { %2015 = vrot.lane.b32.xlu0 %v1754_v0, %s3263_s9  ;;  %v1923_v37 = vshll.u32 %v1754_v0, 16  ;;  %v1934_v25 = vrot.slane %v1754_v0, 1  ;;  %v1921_v32 = vshrl.u32 %v1754_v0, 16  ;;  %v1930_v17 = vrot.slane %v1928_v7, 1  ;;  %s2717_s9 = sshll.u32 %s3245_s24, 4 }
 0x1fd   : > { %p281_p13 = scmp.lt.s32.totalorder %s2717_s9, 31 }
 0x1fe   : > { %v1925_v14 = vrot.slane %v1923_v37, 1  ;;  %v4411_v30 = vsel %vm1878_vm2, %v1934_v25, %v1935_v20 }
 0x1ff   : > { %s4674_s9 = smov (!%p281_p13, %s2717_s9), 31 }
 0x200   : > { %v1926_v21 = vor.u32 %v1925_v14, %v1921_v32  ;;  %s284_s8 = sadd.s32 %s2718_s30, %s4674_s9  ;;  %s272_s9 = scalar_lea.vmem [#allocation2], %s2715_s20 }
 0x201   : > { %s2719_s13 = sshll.u32 %s284_s8, 3  ;;  %s2599_s30 = sshll.u32 %s272_s9, 4  ;;  %s4582_s30 = int_to_ptr.vmem [resolvable:$true] %s2599_s30 }
 0x202   : > { %v1931_v9 = vsel %vm1765_vm6, %v1926_v21, %v1930_v17  ;;  %s4505_s14 = scalar_lea.vmem %s4641_s5, %s2719_s13  ;;  %s3167_s13 = scalar_lea.vmem %s4582_s30, 128 }
 0x203   : > { %2031 = vrot.lane.b32.xlu0 %v1931_v9, %s4657_s29  ;;  %s2595_s29 = sadd.s32 %s3245_s24, %s2829_s7  ;;  %s2580_s24 = scalar_lea.sflag [#allocation3], %s270_s16 }
 0x204   : > { %s2830_s25 = sshll.u32 %s2595_s29, 7  ;;  %p3168_p0 = scmp.ne.s32.totalorder %s4582_s30, %s3167_s13 }
 0x205   : > { %s4580_s12 = scalar_lea.hbm %s4642_s6, %s2830_s25  ;;  %p3174_p4 = scmp.lt.s32.totalorder %s4582_s30, %s3172_s18 }
 0x206   : > { %p3169_p1 = pnand %p3168_p0, %p3353_p3 }
 0x208   : > { %p3170_p2 = pneg %p3169_p1 }
 0x20c   : > { %v1954_v41 = vpop.permute.xlu1 %1953 }
 0x210   : > { %v1938_v63 = vpop.permute.xlu1 %1937 }
 0x211   : > { %v2034_v54 = vsel %vm971_vm5, %v4155_v22, %v1938_v63 }
 0x212   : > { %v2050_v23 = vsel %vm1002_vm7, %v2034_v54, %v1954_v41 }
 0x214   : > { %v1970_v6 = vpop.permute.xlu1 %1969  ;;  %v1986_v4 = vpop.permute.xlu0 %1985 }
 0x215   : > { %v2091_v18 = vsel %vm971_vm5, %v4214_v44, %v1986_v4  ;;  %v2066_v1 = vsel %vm1023_vm8, %v2050_v23, %v1970_v6 }
 0x218   : > { %v1956_v13 = vpop.permute.xlu1 %1955 }
 0x21a   : > { %v2002_v33 = vpop.permute.xlu0 %2001 }
 0x21b   : > { %v2114_v40 = vsel %vm1002_vm7, %v2091_v18, %v2002_v33 }
 0x21c   : > { %v1940_v12 = vpop.permute.xlu1 %1939 }
 0x21d   : > { %v2036_v44 = vsel %vm971_vm5, %v4182_v46, %v1940_v12 }
 0x21e   : > { %v1988_v5 = vpop.permute.xlu0 %1987 }
 0x21f   : > { %v2094_v38 = vsel %vm971_vm5, %v4228_v10, %v1988_v5 }
 0x220   : > { %v1972_v24 = vpop.permute.xlu1 %1971 }
 0x222   : > { %v2018_v3 = vpop.permute.xlu0 %2017 }
 0x223   : > { %v2130_v52 = vsel %vm1023_vm8, %v2114_v40, %v2018_v3 }
 0x224   : > { %2360 = vmatprep.mubr.bf16.mxu1 %v2130_v52  ;;  %v1958_v29 = vpop.permute.xlu1 %1957 }
 0x225   : > { %2361 = vmatmul.mubr.bf16.vlgmr.msra.gmra.mrb[20].mxu1 %v2066_v1 }
 0x226   : > { %v2004_v15 = vpop.permute.xlu0 %2003  ;;  %3042 = vmatpush3.bf16.msra.mxu1 %v4061_v16  ;;  %v2052_v16 = vsel %vm1002_vm7, %v2036_v44, %v1956_v13 }
 0x227   : > { %3041 = vmatprep.subr.bf16.mxu1 %v4076_v49  ;;  %v2116_v42 = vsel %vm1002_vm7, %v2094_v38, %v2004_v15  ;;  %v2069_v62 = vsel %vm1023_vm8, %v2052_v16, %v1972_v24 }
 0x228   : > { %v1942_v22 = vpop.permute.xlu1 %1941 }
 0x229   : > { %v2038_v46 = vsel %vm971_vm5, %v4208_v60, %v1942_v22 }
 0x22a   : > { %v1990_v51 = vpop.permute.xlu0 %1989  ;;  %3043 = vmatpush3.bf16.msra.mxu1 %v4076_v49  ;;  %v2054_v0 = vsel %vm1002_vm7, %v2038_v46, %v1958_v29 }
 0x22b   : > { %v2097_v10 = vsel %vm971_vm5, %v4257_v50, %v1990_v51 }
 0x22c   : > { %v1974_v19 = vpop.permute.xlu1 %1973 }
 0x22d   : > { %v2072_v25 = vsel %vm1023_vm8, %v2054_v0, %v1974_v19 }
 0x22e   : > { %v2020_v43 = vpop.permute.xlu0 %2019 }
 0x22f   : > { %v2133_v31 = vsel %vm1023_vm8, %v2116_v42, %v2020_v43 }
 0x230   : > { %2368 = vmatprep.mubr.bf16.mxu1 %v2133_v31  ;;  %v1960_v61 = vpop.permute.xlu1 %1959 }
 0x231   : > { %2369 = vmatmul.mubr.bf16.gmra.mrb[24].mxu1 %v2069_v62 }
 0x232   : > { %v2006_v49 = vpop.permute.xlu0 %2005 }
 0x233   : > { %v2118_v48 = vsel %vm1002_vm7, %v2097_v10, %v2006_v49 }
 0x234   : > { %v1944_v55 = vpop.permute.xlu1 %1943 }
 0x235   : > { %v2040_v60 = vsel %vm971_vm5, %v4240_v57, %v1944_v55 }
 0x236   : > { %v1992_v45 = vpop.permute.xlu0 %1991  ;;  %v2056_v41 = vsel %vm1002_vm7, %v2040_v60, %v1960_v61 }
 0x237   : > { %v2100_v50 = vsel %vm971_vm5, %v4286_v26, %v1992_v45 }
 0x238   : > { %v1976_v11 = vpop.permute.xlu1 %1975 }
 0x239   : > { %v2075_v6 = vsel %vm1023_vm8, %v2056_v41, %v1976_v11 }
 0x23a   : > { %v2022_v59 = vpop.permute.xlu0 %2021 }
 0x23b   : > { %v2136_v27 = vsel %vm1023_vm8, %v2118_v48, %v2022_v59 }
 0x23c   : > { %2376 = vmatprep.mubr.bf16.mxu1 %v2136_v27  ;;  %v1962_v37 = vpop.permute.xlu1 %1961 }
 0x23d   : > { %2377 = vmatmul.mubr.bf16.gmra.mrb[28].mxu1 %v2072_v25 }
 0x23e   : > { %v2008_v7 = vpop.permute.xlu0 %2007 }
 0x23f   : > { %v2120_v21 = vsel %vm1002_vm7, %v2100_v50, %v2008_v7 }
 0x240   : > { %v1946_v20 = vpop.permute.xlu1 %1945 }
 0x241   : > { %v2042_v57 = vsel %vm971_vm5, %v4269_v53, %v1946_v20 }
 0x242   : > { %v1994_v32 = vpop.permute.xlu0 %1993  ;;  %v2058_v18 = vsel %vm1002_vm7, %v2042_v57, %v1962_v37 }
 0x243   : > { %v2103_v26 = vsel %vm971_vm5, %v4315_v8, %v1994_v32 }
 0x244   : > { %v1978_v14 = vpop.permute.xlu1 %1977 }
 0x245   : > { %v2078_v40 = vsel %vm1023_vm8, %v2058_v18, %v1978_v14 }
 0x246   : > { %v2024_v17 = vpop.permute.xlu0 %2023 }
 0x247   : > { %v2139_v9 = vsel %vm1023_vm8, %v2120_v21, %v2024_v17 }
 0x248   : > { %2384 = vmatprep.mubr.bf16.mxu1 %v2139_v9  ;;  %v1964_v63 = vpop.permute.xlu1 %1963 }
 0x249   : > { %2385 = vmatmul.mubr.bf16.gmra.mrb[32].mxu1 %v2075_v6 }
 0x24a   : > { %v2010_v4 = vpop.permute.xlu0 %2009 }
 0x24b   : > { %v2122_v5 = vsel %vm1002_vm7, %v2103_v26, %v2010_v4 }
 0x24c   : > { %v1948_v13 = vpop.permute.xlu1 %1947 }
 0x24d   : > { %v2044_v53 = vsel %vm971_vm5, %v4298_v39, %v1948_v13 }
 0x24e   : > { %v1996_v33 = vpop.permute.xlu0 %1995  ;;  %v2060_v51 = vsel %vm1002_vm7, %v2044_v53, %v1964_v63 }
 0x24f   : > { %v2106_v8 = vsel %vm971_vm5, %v4346_v28, %v1996_v33 }
 0x250   : > { %v1980_v12 = vpop.permute.xlu1 %1979 }
 0x251   : > { %v2081_v44 = vsel %vm1023_vm8, %v2060_v51, %v1980_v12 }
 0x252   : > { %v2026_v54 = vpop.permute.xlu0 %2025 }
 0x253   : > { %v2142_v24 = vsel %vm1023_vm8, %v2122_v5, %v2026_v54 }
 0x254   : > { %2392 = vmatprep.mubr.bf16.mxu1 %v2142_v24  ;;  %v1966_v3 = vpop.permute.xlu1 %1965 }
 0x255   : > { %2393 = vmatmul.mubr.bf16.gmra.mrb[36].mxu1 %v2078_v40 }
 0x256   : > { %v2012_v23 = vpop.permute.xlu0 %2011 }
 0x257   : > { %v2124_v29 = vsel %vm1002_vm7, %v2106_v8, %v2012_v23 }
 0x258   : > { %v1950_v1 = vpop.permute.xlu1 %1949 }
 0x259   : > { %v2046_v39 = vsel %vm971_vm5, %v4327_v36, %v1950_v1 }
 0x25a   : > { %v1998_v52 = vpop.permute.xlu0 %1997  ;;  %v2062_v62 = vsel %vm1002_vm7, %v2046_v39, %v1966_v3 }
 0x25b   : > { %v2109_v28 = vsel %vm971_vm5, %v4378_v2, %v1998_v52 }
 0x25c   : > { %v1982_v19 = vpop.permute.xlu1 %1981 }
 0x25d   : > { %v2084_v49 = vsel %vm1023_vm8, %v2062_v62, %v1982_v19 }
 0x25e   : > { %v2028_v15 = vpop.permute.xlu0 %2027 }
 0x25f   : > { %v2145_v22 = vsel %vm1023_vm8, %v2124_v29, %v2028_v15 }
 0x260   : > { %2400 = vmatprep.mubr.bf16.mxu1 %v2145_v22  ;;  %v1968_v43 = vpop.permute.xlu1 %1967 }
 0x261   : > { %2401 = vmatmul.mubr.bf16.gmra.mrb[40].mxu1 %v2081_v44 }
 0x262   : > { %v2014_v38 = vpop.permute.xlu0 %2013 }
 0x263   : > { %v2126_v31 = vsel %vm1002_vm7, %v2109_v28, %v2014_v38 }
 0x264   : > { %v1952_v55 = vpop.permute.xlu1 %1951 }
 0x265   : > { %v2048_v36 = vsel %vm971_vm5, %v4359_v58, %v1952_v55 }
 0x266   : > { %v2000_v42 = vpop.permute.xlu0 %1999  ;;  %v2064_v59 = vsel %vm1002_vm7, %v2048_v36, %v1968_v43 }
 0x267   : > { %v2112_v46 = vsel %vm971_vm5, %v4401_v56, %v2000_v42 }
 0x268   : > { %v1984_v2 = vpop.permute.xlu1 %1983 }
 0x269   : > { %v2087_v27 = vsel %vm1023_vm8, %v2064_v59, %v1984_v2 }
 0x26a   : > { %v2030_v16 = vpop.permute.xlu0 %2029 }
 0x26b   : > { %v2148_v61 = vsel %vm1023_vm8, %v2126_v31, %v2030_v16 }
 0x26c   : > { %2408 = vmatprep.mubr.bf16.mxu1 %v2148_v61 }
 0x26d   : > { %2409 = vmatmul.mubr.bf16.gmra.mrb[44].mxu1 %v2084_v49 }
 0x26e   : > { %v2016_v45 = vpop.permute.xlu0 %2015 }
 0x26f   : > { %v2128_v11 = vsel %vm1002_vm7, %v2112_v46, %v2016_v45 }
 0x275   : > { %v2032_v10 = vpop.permute.xlu0 %2031 }
 0x276   : > { %v2151_v48 = vsel %vm1023_vm8, %v2128_v11, %v2032_v10 }
 0x277   : > { %2416 = vmatprep.mubr.bf16.mxu1 %v2151_v48 }
 0x278   : > { %2417 = vmatmul.mubr.bf16.gmra.mrb[48].mxu1 %v2087_v27 }
 0x279   : > { %3032 = vmatprep.mubr.msk.bf16.mxu1 %vm971_vm5, %v4336_v34 }
 0x280   : > { %3033 = vmatmul.mubr.msk.bf16.vlgmr.msra.gmra.mrb[52].mxu1 %vm971_vm5, %v4368_v47  ;;  %v4499_v47 = vld [vmem:[%s4640_s4] ss:$0 sm:$0xff] }
 0x281   : > { %3036 = vmatprep.mubr.msk.bf16.mxu1 %vm971_vm5, %v4395_v35 }
 0x288   : > { %3037 = vmatmul.mubr.msk.bf16.gmra.mrb[56].mxu1 %vm971_vm5, %v4411_v30 }
 0x28a   : > { %v3026_v58 = vpop.f32.mrb[40].mxu0 }
 0x28b   : > { %v2459_v56 = vpop.f32.mrb[41].mxu0 }
 0x28c   : > { %v3027_v0 = vpop.f32.mrb[42].mxu0 }
 0x28d   : > { %v2462_v37 = vpop.f32.mrb[43].mxu0 }
 0x2a2   : > { %v4490_v25 = vpop.f32.mrb[44].mxu0 }
 0x2a3   : > { %v2475_v7 = vpop.f32.mrb[45].mxu0 }
 0x2a4   : > { %v4492_v20 = vpop.f32.mrb[46].mxu0 }
 0x2a5   : > { %v2478_v32 = vpop.f32.mrb[47].mxu0 }
 0x2f8   : > { %v2938_v34 = vpop.f32.mrb[20].mxu1 }
 0x2f9   : > { %v2939_v35 = vpop.f32.mrb[21].mxu1 }
 0x2fa   : > { %v2940_v30 = vadd.f32 %v2939_v35, %v2938_v34  ;;  %v2941_v60 = vpop.f32.mrb[22].mxu1 }
 0x2fb   : > { %v2942_v14 = vpop.f32.mrb[23].mxu1 }
 0x2fc   : > { %v2363_v50 = vadd.f32 %v2940_v30, %v4499_v47  ;;  %v2943_v21 = vadd.f32 %v2942_v14, %v2941_v60 }
 0x2fe   : > { %v2460_v17 = vadd.f32 %v2459_v56, %v2363_v50  ;;  %v2366_v9 = vadd.f32 %v2943_v21, %v4499_v47 }
 0x300   : > { %2522 = vst.msk [vmem:[%s4505_s14] sm:$0xff] %vm971_vm5, %v2460_v17  ;;  %v2463_v41 = vadd.f32 %v2462_v37, %v2366_v9  ;;  %v2538_v63 = vsel %vm971_vm5, %v2460_v17, 0.0 }
 0x302   : > { %2523 = vst.msk [vmem:[%s4505_s14 + $0x8] sm:$0xff] %vm971_vm5, %v2463_v41  ;;  %v2539_v6 = vsel %vm971_vm5, %v2463_v41, 0.0 }
 0x303   : > { %v2540_v4 = vadd.f32 %v2539_v6, %v2538_v63 }
 0x304   : > { %v2944_v13 = vpop.f32.mrb[24].mxu1 }
 0x305   : > { %v2945_v33 = vpop.f32.mrb[25].mxu1 }
 0x306   : > { %v2946_v57 = vadd.f32 %v2945_v33, %v2944_v13  ;;  %v2947_v12 = vpop.f32.mrb[26].mxu1 }
 0x307   : > { %v2948_v26 = vpop.f32.mrb[27].mxu1 }
 0x308   : > { %v2371_v5 = vadd.f32 %v2946_v57, %v4499_v47  ;;  %v2949_v54 = vadd.f32 %v2948_v26, %v2947_v12 }
 0x30a   : > { %v2468_v24 = vadd.f32 %v3026_v58, %v2371_v5  ;;  %v2374_v18 = vadd.f32 %v2949_v54, %v4499_v47 }
 0x30c   : > { %2524 = vst.msk [vmem:[%s4505_s14 + $0x10] sm:$0xff] %vm971_vm5, %v2468_v24  ;;  %v2541_v40 = vsel %vm971_vm5, %v2468_v24, 0.0  ;;  %v2471_v3 = vadd.f32 %v3027_v0, %v2374_v18 }
 0x30d   : > { %v2542_v23 = vadd.f32 %v2541_v40, %v2540_v4 }
 0x30e   : > { %2525 = vst.msk [vmem:[%s4505_s14 + $0x18] sm:$0xff] %vm971_vm5, %v2471_v3  ;;  %v2543_v52 = vsel %vm971_vm5, %v2471_v3, 0.0 }
 0x30f   : > { %v2544_v53 = vadd.f32 %v2543_v52, %v2542_v23 }
 0x310   : > { %v2950_v1 = vpop.f32.mrb[28].mxu1 }
 0x311   : > { %v2951_v8 = vpop.f32.mrb[29].mxu1 }
 0x312   : > { %v2952_v29 = vadd.f32 %v2951_v8, %v2950_v1  ;;  %v2953_v15 = vpop.f32.mrb[30].mxu1 }
 0x313   : > { %v2954_v22 = vpop.f32.mrb[31].mxu1 }
 0x314   : > { %v2379_v51 = vadd.f32 %v2952_v29, %v4499_v47  ;;  %v2955_v44 = vadd.f32 %v2954_v22, %v2953_v15 }
 0x316   : > { %v2476_v19 = vadd.f32 %v2475_v7, %v2379_v51  ;;  %v2382_v38 = vadd.f32 %v2955_v44, %v4499_v47 }
 0x318   : > { %2526 = vst.msk [vmem:[%s4505_s14 + $0x20] sm:$0xff] %vm971_vm5, %v2476_v19  ;;  %v2545_v42 = vsel %vm971_vm5, %v2476_v19, 0.0  ;;  %v2479_v39 = vadd.f32 %v2478_v32, %v2382_v38 }
 0x319   : > { %v2546_v43 = vadd.f32 %v2545_v42, %v2544_v53 }
 0x31a   : > { %2527 = vst.msk [vmem:[%s4505_s14 + $0x28] sm:$0xff] %vm971_vm5, %v2479_v39  ;;  %v2547_v28 = vsel %vm971_vm5, %v2479_v39, 0.0 }
 0x31b   : > { %v2548_v31 = vadd.f32 %v2547_v28, %v2546_v43 }
 0x31c   : > { %v2956_v16 = vpop.f32.mrb[32].mxu1 }
 0x31d   : > { %v2957_v61 = vpop.f32.mrb[33].mxu1 }
 0x31e   : > { %v2958_v62 = vadd.f32 %v2957_v61, %v2956_v16  ;;  %v2959_v49 = vpop.f32.mrb[34].mxu1 }
 0x31f   : > { %v2960_v55 = vpop.f32.mrb[35].mxu1 }
 0x320   : > { %v2387_v45 = vadd.f32 %v2958_v62, %v4499_v47  ;;  %v2961_v36 = vadd.f32 %v2960_v55, %v2959_v49 }
 0x322   : > { %v2484_v46 = vadd.f32 %v4490_v25, %v2387_v45  ;;  %v2390_v2 = vadd.f32 %v2961_v36, %v4499_v47 }
 0x324   : > { %2528 = vst.msk [vmem:[%s4505_s14 + $0x30] sm:$0xff] %vm971_vm5, %v2484_v46  ;;  %v2549_v11 = vsel %vm971_vm5, %v2484_v46, 0.0  ;;  %v2487_v10 = vadd.f32 %v4492_v20, %v2390_v2 }
 0x325   : > { %v2550_v48 = vadd.f32 %v2549_v11, %v2548_v31 }
 0x326   : > { %2529 = vst.msk [vmem:[%s4505_s14 + $0x38] sm:$0xff] %vm971_vm5, %v2487_v10  ;;  %v2551_v59 = vsel %vm971_vm5, %v2487_v10, 0.0 }
 0x327   : > { %v2552_v27 = vadd.f32 %v2551_v59, %v2550_v48 }
 0x328   : > { %v2962_v58 = vpop.f32.mrb[36].mxu1 }
 0x329   : > { %v2963_v56 = vpop.f32.mrb[37].mxu1 }
 0x32a   : > { %v2964_v0 = vadd.f32 %v2963_v56, %v2962_v58  ;;  %v2965_v37 = vpop.f32.mrb[38].mxu1 }
 0x32b   : > { %v2966_v7 = vpop.f32.mrb[39].mxu1 }
 0x32c   : > { %v2967_v25 = vadd.f32 %v2966_v7, %v2965_v37  ;;  %v2395_v5 = vadd.f32 %v2964_v0, %v4499_v47 }
 0x32e   : > { %v2398_v23 = vadd.f32 %v2967_v25, %v4499_v47 }
 0x334   : > { %v2968_v32 = vpop.f32.mrb[40].mxu1 }
 0x335   : > { %v2969_v34 = vpop.f32.mrb[41].mxu1 }
 0x336   : > { %v2970_v35 = vadd.f32 %v2969_v34, %v2968_v32  ;;  %v2971_v30 = vpop.f32.mrb[42].mxu1 }
 0x337   : > { %v2972_v60 = vpop.f32.mrb[43].mxu1 }
 0x338   : > { %v2973_v14 = vadd.f32 %v2972_v60, %v2971_v30  ;;  %v2403_v12 = vadd.f32 %v2970_v35, %v4499_v47 }
 0x33a   : > { %v2406_v18 = vadd.f32 %v2973_v14, %v4499_v47 }
 0x340   : > { %v2974_v50 = vpop.f32.mrb[44].mxu1 }
 0x341   : > { %v2975_v20 = vpop.f32.mrb[45].mxu1 }
 0x342   : > { %v2976_v21 = vadd.f32 %v2975_v20, %v2974_v50  ;;  %v2977_v17 = vpop.f32.mrb[46].mxu1 }
 0x343   : > { %v2978_v9 = vpop.f32.mrb[47].mxu1 }
 0x344   : > { %v2979_v41 = vadd.f32 %v2978_v9, %v2977_v17  ;;  %v2411_v38 = vadd.f32 %v2976_v21, %v4499_v47 }
 0x346   : > { %v2414_v62 = vadd.f32 %v2979_v41, %v4499_v47 }
 0x34b   : > { %v2980_v63 = vpop.f32.mrb[48].mxu1 }
 0x34c   : > { %v2981_v6 = vpop.f32.mrb[49].mxu1 }
 0x34d   : > { %v2982_v4 = vadd.f32 %v2981_v6, %v2980_v63  ;;  %v2983_v13 = vpop.f32.mrb[50].mxu1 }
 0x34e   : > { %v2984_v33 = vpop.f32.mrb[51].mxu1 }
 0x34f   : > { %v2985_v57 = vadd.f32 %v2984_v33, %v2983_v13  ;;  %v2419_v51 = vadd.f32 %v2982_v4, %v4499_v47 }
 0x351   : > { %v2422_v28 = vadd.f32 %v2985_v57, %v4499_v47 }
 0x353   : > { %v3034_v26 = vpop.f32.mrb[52].mxu1 }
 0x354   : > { %v2500_v54 = vadd.f32 %v3034_v26, %v2403_v12  ;;  %v2491_v24 = vpop.f32.mrb[53].mxu1 }
 0x355   : > { %v2492_v40 = vadd.f32 %v2491_v24, %v2395_v5  ;;  %v3035_v3 = vpop.f32.mrb[54].mxu1 }
 0x356   : > { %2532 = vst.msk [vmem:[%s4505_s14 + $0x50] sm:$0xff] %vm971_vm5, %v2500_v54  ;;  %v2503_v52 = vadd.f32 %v3035_v3, %v2406_v18  ;;  %v2494_v53 = vpop.f32.mrb[55].mxu1  ;;  %v2557_v44 = vsel %vm971_vm5, %v2500_v54, 0.0 }
 0x357   : > { %2530 = vst.msk [vmem:[%s4505_s14 + $0x40] sm:$0xff] %vm971_vm5, %v2492_v40  ;;  %v2553_v1 = vsel %vm971_vm5, %v2492_v40, 0.0  ;;  %v2495_v8 = vadd.f32 %v2494_v53, %v2398_v23 }
 0x358   : > { %v2554_v29 = vadd.f32 %v2553_v1, %v2552_v27  ;;  %2533 = vst.msk [vmem:[%s4505_s14 + $0x58] sm:$0xff] %vm971_vm5, %v2503_v52  ;;  %v2559_v31 = vsel %vm971_vm5, %v2503_v52, 0.0 }
 0x359   : > { %2531 = vst.msk [vmem:[%s4505_s14 + $0x48] sm:$0xff] %vm971_vm5, %v2495_v8  ;;  %v2555_v15 = vsel %vm971_vm5, %v2495_v8, 0.0 }
 0x35a   : > { %v2556_v22 = vadd.f32 %v2555_v15, %v2554_v29 }
 0x35b   : > { %v3038_v19 = vpop.f32.mrb[56].mxu1 }
 0x35c   : > { %v2558_v42 = vadd.f32 %v2557_v44, %v2556_v22  ;;  %v2516_v39 = vadd.f32 %v3038_v19, %v2419_v51  ;;  %v2507_v43 = vpop.f32.mrb[57].mxu1 }
 0x35d   : > { %v2508_v16 = vadd.f32 %v2507_v43, %v2411_v38  ;;  %v3039_v61 = vpop.f32.mrb[58].mxu1 }
 0x35e   : > { %2536 = vst.msk [vmem:[%s4505_s14 + $0x70] sm:$0xff] %vm971_vm5, %v2516_v39  ;;  %v2560_v49 = vadd.f32 %v2559_v31, %v2558_v42  ;;  %v2519_v55 = vadd.f32 %v3039_v61, %v2422_v28  ;;  %v2510_v45 = vpop.f32.mrb[59].mxu1  ;;  %v2565_v10 = vsel %vm971_vm5, %v2516_v39, 0.0 }
 0x35f   : > { %2534 = vst.msk [vmem:[%s4505_s14 + $0x60] sm:$0xff] %vm971_vm5, %v2508_v16  ;;  %v2561_v36 = vsel %vm971_vm5, %v2508_v16, 0.0  ;;  %v2511_v46 = vadd.f32 %v2510_v45, %v2414_v62 }
 0x360   : > { %v2562_v2 = vadd.f32 %v2561_v36, %v2560_v49  ;;  %2537 = vst.msk [vmem:[%s4505_s14 + $0x78] sm:$0xff] %vm971_vm5, %v2519_v55  ;;  %v2567_v59 = vsel %vm971_vm5, %v2519_v55, 0.0 }
 0x361   : > { %2535 = vst.msk [vmem:[%s4505_s14 + $0x68] sm:$0xff] %vm971_vm5, %v2511_v46  ;;  %v2563_v47 = vsel %vm971_vm5, %v2511_v46, 0.0  ;;  %s3173_s14 = scalar_lea.vmem %s3172_s18, 256 }
 0x362   : > { %v2564_v11 = vadd.f32 %v2563_v47, %v2562_v2  ;;  %p3175_p5 = scmp.lt.s32.totalorder %s3173_s14, %s3167_s13 }
 0x364   : > { %v2566_v48 = vadd.f32 %v2565_v10, %v2564_v11  ;;  %p3176_p6 = por %p3175_p5, %p3174_p4 }
 0x366   : > { %v2568_v27 = vadd.f32 %v2567_v59, %v2566_v48  ;;  %p3177_p7 = pnand %p3176_p6, %p3170_p2 }
 0x368   : > { %2569 = vst.msk [vmem:[%s272_s9] sm:$0xff] %vm971_vm5, %v2568_v27 }
 0x369   : > { %3180 = shalt.err (!%p3177_p7)
}
 0x36a   : > { %s3181_s16 = scalar_lea.hbm %s4580_s12, 128  ;;  %s3185_s29 = scalar_lea.hbm %s4642_s6, 512 }
 0x36b   : > { %p3182_p9 = scmp.ne.s32.totalorder %s4580_s12, %s3181_s16  ;;  %p3186_p12 = scmp.lt.u32.totalorder %s4580_s12, %s4642_s6 }
 0x36c   : > { %p3187_p13 = scmp.lt.u32.totalorder %s3185_s29, %s3181_s16  ;;  %p3189_p1 = scmp.lt.u32.totalorder %s3181_s16, %s4580_s12 }
 0x36d   : > { %p3183_p10 = pnand %p3182_p9, %p3353_p3 }
 0x36e   : > { %p3188_p0 = por %p3187_p13, %p3186_p12 }
 0x36f   : > { %p3184_p11 = pneg %p3183_p10 }
 0x370   : > { %p3190_p2 = por %p3189_p1, %p3188_p0 }
 0x372   : > { %p3191_p4 = pnand %p3190_p2, %p3184_p11 }
 0x374   : > { %3194 = shalt.err (!%p3191_p4)
}
 0x375   : > { %3045 = dma.vmem_to_hbm [thread:$0]  (%p3353_p3), %s4582_s30, 128, %s4580_s12, %s2580_s24  }
 0x376 PF: > { %p3051_p5 = scmp.ge.s32.totalorder %s3261_s28, 2  ;;  %s2623_s8 = sand.u32 1, %s3233_s21  }
 0x377   : > { %s2624_s19 = scalar_lea.sflag [#allocation3], %s2623_s8 }
 0x378   : > { %p3048_p6 = pnand %p3051_p5, %p3362_p8 }
 0x37a   : > { %3228 = dma.done.wait (!%p3048_p6), %s2624_s19, 128  }
 0x37b   : > { %3230 = vsyncadd (!%p3048_p6), %s2624_s19, 4294967168  ;;  %s20_s28 = sadd.s32 1, %s3261_s28   ;;  %s4658_s10 = sld [smem:[#allocation5_spill]] }
 0x37c   : > { %p17_p7 = scmp.ge.s32.totalorder %s20_s28, 6   ;;  %s4659_s30 = sld [smem:[#allocation6_spill]] }
 0x37d   : > { %s4660_s21 = smov %s3237_s22  ;;  %s4661_s22 = smov %s3241_s23 }
 0x37e   : > { %s4662_s23 = smov %s3371_s15  ;;  %s4663_s24 = smov %s3253_s26 }
 0x37f   : > { %s4664_s25 = smov %s3257_s27  ;;  %19 = sbr.rel (!%p17_p7) target bundleno = 5 (0x5), region = 88 }
 0x381   : > { %s4665_s26 = smov %s4658_s10 }
 0x382   : > { %s4666_s27 = smov %s4659_s30 }
 0x386   :  { %2629 = vsyncpa [#allocation3], 1 }
 0x387   :  { %2631 = vsyncpa [#allocation3 + $0x1], 1 }

</bundles_post_ra>
